<compile_context>
chip_gen: v7x
topology: tpu7x:2x2x1
jax: 0.10.0
libtpu: 0.0.40
codegen_flags: <defaults>
</compile_context>

<pallas_src>
import functools
import math

import jax
import jax.numpy as jnp
from jax.experimental import pallas as pl
from jax.experimental.pallas import tpu as pltpu


# ----------------------------------------------------------------------------
# One-time parameter preparation (pre-transpose / pack / reorder gates / pad)
# ----------------------------------------------------------------------------
def _reorder_gates(w):
    """Reorder PyTorch packed LSTM gates i|f|g|o -> i|f|o|g along axis 0."""
    H = w.shape[0] // 4
    return jnp.concatenate([w[: 2 * H], w[3 * H :], w[2 * H : 3 * H]], axis=0)


def prepare_kernel_params(params):
    lstm = params["lstm"]
    L = len(lstm)
    H = lstm[0]["w_hh"].shape[1]
    D = lstm[0]["w_ih"].shape[1]
    V = params["linear"]["W"].shape[0]
    Vp = ((V + 127) // 128) * 128          # lane-dense logits (unmasked stores)

    kp = {"L": L, "H": H, "D": D, "V": V, "V_pad": Vp}
    l0 = lstm[0]
    kp["wih0"] = _reorder_gates(l0["w_ih"]).T                     # (D, 4H)
    kp["whh0"] = _reorder_gates(l0["w_hh"]).T                     # (H, 4H)
    kp["b0"] = _reorder_gates(l0["b_ih"] + l0["b_hh"])[None, :]   # (1, 4H)
    kp["wcat"], kp["brest"] = [], []
    for l in range(1, L):
        ll = lstm[l]
        # fused [h_{l-1} | h_l] @ [W_ih; W_hh] -> one MXU push per step/layer
        kp["wcat"].append(jnp.concatenate(
            [_reorder_gates(ll["w_ih"]).T, _reorder_gates(ll["w_hh"]).T], axis=0))
        kp["brest"].append(_reorder_gates(ll["b_ih"] + ll["b_hh"])[None, :])
    Wl = params["linear"]["W"].T                                   # (H, V)
    kp["wl"] = jnp.pad(Wl, ((0, 0), (0, Vp - V)))                  # (H, Vp)
    kp["bl"] = jnp.pad(params["linear"]["b"], ((0, Vp - V),))[None, :]
    return kp


# ----------------------------------------------------------------------------
# Fused Pallas kernel: all LSTM layers + hoisted final Linear, single call
# ----------------------------------------------------------------------------
def _build_kernel(L, T, B, H, Vp):
    def kernel(*refs):
        pos = 0
        x_ref = refs[pos]; pos += 1                       # (T*B, D) time-major
        wih0_ref = refs[pos]; whh0_ref = refs[pos + 1]; b0_ref = refs[pos + 2]
        pos += 3
        wcat_refs, brest_refs = [], []
        for _ in range(L - 1):
            wcat_refs.append(refs[pos]); brest_refs.append(refs[pos + 1]); pos += 2
        wl_ref = refs[pos]; bl_ref = refs[pos + 1]; pos += 2
        h0_ref = refs[pos]; c0_ref = refs[pos + 1]; pos += 2
        out_ref = refs[pos]; hn_ref = refs[pos + 1]; cn_ref = refs[pos + 2]

        f32 = jnp.float32

        # Hoisted layer-0 input projection: one (T*B, D) @ (D, 4H) matmul.
        xg = (jnp.dot(x_ref[...], wih0_ref[...], preferred_element_type=f32)
              + b0_ref[...])                              # (T*B, 4H)

        whh0 = whh0_ref[...]
        wcats = [w[...] for w in wcat_refs]
        # Pre-broadcast recurrent biases ONCE (no per-iter broadcast_in_dim).
        brest_b = [jnp.broadcast_to(b[...], (B, 4 * H)) for b in brest_refs]
        wl = wl_ref[...]

        h = [h0_ref[l] for l in range(L)]                 # each (B, H)
        c = [c0_ref[l] for l in range(L)]

        def cell(g, c_prev):
            # Gate columns pre-reordered to i|f|o|g -> contiguous sigmoid/tanh.
            sig = jax.nn.sigmoid(g[:, : 3 * H])
            gg = jnp.tanh(g[:, 3 * H :])
            i_g = sig[:, :H]
            f_g = sig[:, H : 2 * H]
            o_g = sig[:, 2 * H : 3 * H]
            c_new = f_g * c_prev + i_g * gg
            h_new = o_g * jnp.tanh(c_new)
            return h_new, c_new

        # Static, fully-unrolled time loop (T small & fixed); h/c stay in
        # vregs.  Only the two recurrent dots per step remain on the serial
        # MXU dependence chain; the vocab projection happens after the loop.
        # TODO(synk): wavefront (diagonal) the layer loop for deep stacks.
        h_top = []
        for t in range(T):
            g0 = (xg[t * B : (t + 1) * B, :]
                  + jnp.dot(h[0], whh0, preferred_element_type=f32))
            h[0], c[0] = cell(g0, c[0])
            for l in range(1, L):
                # TODO(synk): inter-layer dropout is train-mode only in
                # PyTorch; eval-mode semantics (no dropout) implemented here.
                hcat = jnp.concatenate([h[l - 1], h[l]], axis=1)      # (B, 2H)
                gl = (jnp.dot(hcat, wcats[l - 1], preferred_element_type=f32)
                      + brest_b[l - 1])
                h[l], c[l] = cell(gl, c[l])
            h_top.append(h[L - 1])

        # Hoisted vocab projection: ONE batched (T*B, H) @ (H, Vp) matmul,
        # one bias add, one dense 128-lane-aligned store.
        h_all = jnp.concatenate(h_top, axis=0)                        # (T*B, H)
        out_ref[...] = (jnp.dot(h_all, wl, preferred_element_type=f32)
                        + bl_ref[...])

        for l in range(L):
            hn_ref[l] = h[l]
            cn_ref[l] = c[l]

    return kernel


# ----------------------------------------------------------------------------
# Forward wrapper (padding / layout glue in plain JAX)
# ----------------------------------------------------------------------------
def nnlm_forward(kp, inp_btd, hidden):
    """inp_btd: (B, T, size_of_one_hot); hidden = (h0, c0), each (L, B, H).
    Returns (logits (B*T, size_of_one_hot), (h_n, c_n))."""
    h0, c0 = hidden
    B, T, D = inp_btd.shape
    L, H, V, Vp = kp["L"], kp["H"], kp["V"], kp["V_pad"]
    Bp = max(8, ((B + 7) // 8) * 8)            # pad batch to sublane multiple

    x_p = jnp.pad(inp_btd.astype(jnp.float32), ((0, Bp - B), (0, 0), (0, 0)))
    x_tm = jnp.transpose(x_p, (1, 0, 2)).reshape(T * Bp, D)   # time-major rows
    h0_p = jnp.pad(h0.astype(jnp.float32), ((0, 0), (0, Bp - B), (0, 0)))
    c0_p = jnp.pad(c0.astype(jnp.float32), ((0, 0), (0, Bp - B), (0, 0)))

    args = [x_tm, kp["wih0"], kp["whh0"], kp["b0"]]
    for l in range(1, L):
        args += [kp["wcat"][l - 1], kp["brest"][l - 1]]
    args += [kp["wl"], kp["bl"], h0_p, c0_p]

    out, hn, cn = pl.pallas_call(
        _build_kernel(L, T, Bp, H, Vp),
        out_shape=(jax.ShapeDtypeStruct((T * Bp, Vp), jnp.float32),   # time-major
                   jax.ShapeDtypeStruct((L, Bp, H), jnp.float32),
                   jax.ShapeDtypeStruct((L, Bp, H), jnp.float32)),
        compiler_params=pltpu.CompilerParams(
            vmem_limit_bytes=32 * 1024 * 1024),
    )(*args)

    # Cheap wrapper-side reorder: (T, Bp, Vp) -> (Bp, T, Vp); rows end up in
    # b-major (b*T + t) order, matching `output.reshape(-1, units); linear(...)`.
    logits = (out.reshape(T, Bp, Vp)
                 .transpose(1, 0, 2)[:B, :, :V]
                 .reshape(B * T, V))
    return logits, (hn[:, :B, :], cn[:, :B, :])


# ----------------------------------------------------------------------------
# Deterministic parameter init (matches nn.LSTM / nn.Linear shapes)
# ----------------------------------------------------------------------------
def init_params(key, size_of_one_hot, units_of_rnn, layers_of_rnn):
    H = units_of_rnn
    bound = 1.0 / math.sqrt(H)
    params = {"lstm": [], "linear": {}}
    for l in range(layers_of_rnn):
        d_in = size_of_one_hot if l == 0 else H
        k = jax.random.fold_in(key, l)
        k1, k2, k3, k4 = jax.random.split(k, 4)
        params["lstm"].append({
            "w_ih": jax.random.uniform(k1, (4 * H, d_in), jnp.float32, -bound, bound),
            "w_hh": jax.random.uniform(k2, (4 * H, H), jnp.float32, -bound, bound),
            "b_ih": jax.random.uniform(k3, (4 * H,), jnp.float32, -bound, bound),
            "b_hh": jax.random.uniform(k4, (4 * H,), jnp.float32, -bound, bound),
        })
    kl = jax.random.fold_in(key, 1000)
    kw, kb = jax.random.split(kl)
    params["linear"]["W"] = jax.random.uniform(
        kw, (size_of_one_hot, H), jnp.float32, -bound, bound)
    params["linear"]["b"] = jax.random.uniform(
        kb, (size_of_one_hot,), jnp.float32, -bound, bound)
    return params


# ----------------------------------------------------------------------------
# Pure-JAX reference (for correctness check)
# ----------------------------------------------------------------------------
def nnlm_forward_ref(params, inp_btd, hidden):
    h0_all, c0_all = hidden
    B, T, _ = inp_btd.shape
    H = params["lstm"][0]["w_hh"].shape[1]
    x = inp_btd
    h_finals, c_finals = [], []
    for l, layer in enumerate(params["lstm"]):
        h = h0_all[l]
        c = c0_all[l]
        ys = []
        for t in range(T):
            g = (x[:, t, :] @ layer["w_ih"].T + layer["b_ih"]
                 + h @ layer["w_hh"].T + layer["b_hh"])
            i = jax.nn.sigmoid(g[:, 0 * H:1 * H])
            f = jax.nn.sigmoid(g[:, 1 * H:2 * H])
            gg = jnp.tanh(g[:, 2 * H:3 * H])
            o = jax.nn.sigmoid(g[:, 3 * H:4 * H])
            c = f * c + i * gg
            h = o * jnp.tanh(c)
            ys.append(h)
        x = jnp.stack(ys, axis=1)
        h_finals.append(h)
        c_finals.append(c)
    flat = x.reshape(-1, H)
    logits = flat @ params["linear"]["W"].T + params["linear"]["b"]
    return logits, (jnp.stack(h_finals), jnp.stack(c_finals))


if __name__ == "__main__":
    # Small shapes implied by the module: vocab (one-hot) 16, hidden 32,
    # 2 LSTM layers, batch 2, sequence length 8.
    size_of_one_hot, units_of_rnn, layers_of_rnn = 16, 32, 2
    B, T = 2, 8

    key = jax.random.PRNGKey(0)
    kp_key, kx = jax.random.split(key)
    params = init_params(kp_key, size_of_one_hot, units_of_rnn, layers_of_rnn)
    kparams = prepare_kernel_params(params)     # one-time weight prep

    inp = jax.random.normal(kx, (B, T, size_of_one_hot), jnp.float32)
    # init_states(batch_size): zeros (L, B, H) for h and c.
    h0 = jnp.zeros((layers_of_rnn, B, units_of_rnn), jnp.float32)
    c0 = jnp.zeros((layers_of_rnn, B, units_of_rnn), jnp.float32)

    forward = jax.jit(functools.partial(nnlm_forward, kparams))
    logits, (h_n, c_n) = forward(inp, (h0, c0))
    jax.block_until_ready((logits, h_n, c_n))

    ref_logits, (ref_h, ref_c) = nnlm_forward_ref(params, inp, (h0, c0))
    assert logits.shape == (B * T, size_of_one_hot)
    assert h_n.shape == (layers_of_rnn, B, units_of_rnn)
    assert c_n.shape == (layers_of_rnn, B, units_of_rnn)
    # Tolerance covers TPU default-precision matmul differences between the
    # fused kernel and the XLA reference; semantic bugs would be O(1e-1+).
    assert jnp.allclose(logits, ref_logits, atol=2e-3, rtol=2e-3)
    assert jnp.allclose(h_n, ref_h, atol=2e-3, rtol=2e-3)
    assert jnp.allclose(c_n, ref_c, atol=2e-3, rtol=2e-3)

    print("KERNEL_OK")
</pallas_src>

<mosaic_0001>
module attributes {stable_mosaic.version = 11 : i64} {
  func.func @kernel(%arg0: memref<64x16xf32, #tpu.memory_space<vmem>>, %arg1: memref<16x128xf32, #tpu.memory_space<vmem>>, %arg2: memref<32x128xf32, #tpu.memory_space<vmem>>, %arg3: memref<1x128xf32, #tpu.memory_space<vmem>>, %arg4: memref<64x128xf32, #tpu.memory_space<vmem>>, %arg5: memref<1x128xf32, #tpu.memory_space<vmem>>, %arg6: memref<32x128xf32, #tpu.memory_space<vmem>>, %arg7: memref<1x128xf32, #tpu.memory_space<vmem>>, %arg8: memref<2x8x32xf32, #tpu.memory_space<vmem>>, %arg9: memref<2x8x32xf32, #tpu.memory_space<vmem>>, %arg10: memref<64x128xf32, #tpu.memory_space<vmem>>, %arg11: memref<2x8x32xf32, #tpu.memory_space<vmem>>, %arg12: memref<2x8x32xf32, #tpu.memory_space<vmem>>) attributes {dimension_semantics = [], scalar_prefetch = 0 : i64, scratch_operands = 0 : i64, tpu.core_type = #tpu.core_type<tc>} {
    %c0 = arith.constant 0 : index
    %c0_0 = arith.constant 0 : index
    %0 = vector.load %arg0[%c0, %c0_0] : memref<64x16xf32, #tpu.memory_space<vmem>>, vector<64x16xf32>
    %c0_1 = arith.constant 0 : index
    %c0_2 = arith.constant 0 : index
    %1 = vector.load %arg1[%c0_1, %c0_2] : memref<16x128xf32, #tpu.memory_space<vmem>>, vector<16x128xf32>
    %cst = arith.constant dense<0.000000e+00> : vector<64x128xf32>
    %2 = tpu.matmul %0, %1, %cst {dimension_numbers = #tpu.dot_dimension_numbers<[1], [0], [0], [1], [0, 0, 1, 1], [], []>} : vector<64x16xf32>, vector<16x128xf32>, vector<64x128xf32> -> vector<64x128xf32>
    %c0_3 = arith.constant 0 : index
    %c0_4 = arith.constant 0 : index
    %3 = vector.load %arg3[%c0_3, %c0_4] : memref<1x128xf32, #tpu.memory_space<vmem>>, vector<1x128xf32>
    %4 = vector.broadcast %3 : vector<1x128xf32> to vector<64x128xf32>
    %5 = arith.addf %2, %4 : vector<64x128xf32>
    %c0_5 = arith.constant 0 : index
    %c0_6 = arith.constant 0 : index
    %6 = vector.load %arg2[%c0_5, %c0_6] : memref<32x128xf32, #tpu.memory_space<vmem>>, vector<32x128xf32>
    %c0_7 = arith.constant 0 : index
    %c0_8 = arith.constant 0 : index
    %7 = vector.load %arg4[%c0_7, %c0_8] : memref<64x128xf32, #tpu.memory_space<vmem>>, vector<64x128xf32>
    %c0_9 = arith.constant 0 : index
    %c0_10 = arith.constant 0 : index
    %8 = vector.load %arg5[%c0_9, %c0_10] : memref<1x128xf32, #tpu.memory_space<vmem>>, vector<1x128xf32>
    %9 = vector.shape_cast %8 : vector<1x128xf32> to vector<1x128xf32>
    %10 = vector.broadcast %9 : vector<1x128xf32> to vector<8x128xf32>
    %c0_11 = arith.constant 0 : index
    %c0_12 = arith.constant 0 : index
    %11 = vector.load %arg6[%c0_11, %c0_12] : memref<32x128xf32, #tpu.memory_space<vmem>>, vector<32x128xf32>
    %c0_13 = arith.constant 0 : index
    %c0_14 = arith.constant 0 : index
    %c0_15 = arith.constant 0 : index
    %12 = vector.load %arg8[%c0_13, %c0_14, %c0_15] : memref<2x8x32xf32, #tpu.memory_space<vmem>>, vector<1x8x32xf32>
    %13 = vector.shape_cast %12 : vector<1x8x32xf32> to vector<8x32xf32>
    %c1 = arith.constant 1 : index
    %c0_16 = arith.constant 0 : index
    %c0_17 = arith.constant 0 : index
    %14 = vector.load %arg8[%c1, %c0_16, %c0_17] : memref<2x8x32xf32, #tpu.memory_space<vmem>>, vector<1x8x32xf32>
    %15 = vector.shape_cast %14 : vector<1x8x32xf32> to vector<8x32xf32>
    %c0_18 = arith.constant 0 : index
    %c0_19 = arith.constant 0 : index
    %c0_20 = arith.constant 0 : index
    %16 = vector.load %arg9[%c0_18, %c0_19, %c0_20] : memref<2x8x32xf32, #tpu.memory_space<vmem>>, vector<1x8x32xf32>
    %17 = vector.shape_cast %16 : vector<1x8x32xf32> to vector<8x32xf32>
    %c1_21 = arith.constant 1 : index
    %c0_22 = arith.constant 0 : index
    %c0_23 = arith.constant 0 : index
    %18 = vector.load %arg9[%c1_21, %c0_22, %c0_23] : memref<2x8x32xf32, #tpu.memory_space<vmem>>, vector<1x8x32xf32>
    %19 = vector.shape_cast %18 : vector<1x8x32xf32> to vector<8x32xf32>
    %20 = vector.extract_strided_slice %5 {offsets = [0, 0], sizes = [8, 128], strides = [1, 1]} : vector<64x128xf32> to vector<8x128xf32>
    %cst_24 = arith.constant dense<0.000000e+00> : vector<8x128xf32>
    %21 = tpu.matmul %13, %6, %cst_24 {dimension_numbers = #tpu.dot_dimension_numbers<[1], [0], [0], [1], [0, 0, 1, 1], [], []>} : vector<8x32xf32>, vector<32x128xf32>, vector<8x128xf32> -> vector<8x128xf32>
    %22 = arith.addf %20, %21 : vector<8x128xf32>
    %23 = vector.extract_strided_slice %22 {offsets = [0, 0], sizes = [8, 96], strides = [1, 1]} : vector<8x128xf32> to vector<8x96xf32>
    %24 = arith.negf %23 : vector<8x96xf32>
    %25 = math.exp %24 : vector<8x96xf32>
    %cst_25 = arith.constant 1.000000e+00 : f32
    %26 = vector.broadcast %cst_25 : f32 to vector<8x96xf32>
    %27 = arith.addf %26, %25 : vector<8x96xf32>
    %28 = arith.divf %26, %27 : vector<8x96xf32>
    %29 = vector.extract_strided_slice %22 {offsets = [0, 96], sizes = [8, 32], strides = [1, 1]} : vector<8x128xf32> to vector<8x32xf32>
    %30 = math.tanh %29 : vector<8x32xf32>
    %31 = vector.extract_strided_slice %28 {offsets = [0, 0], sizes = [8, 32], strides = [1, 1]} : vector<8x96xf32> to vector<8x32xf32>
    %32 = vector.extract_strided_slice %28 {offsets = [0, 32], sizes = [8, 32], strides = [1, 1]} : vector<8x96xf32> to vector<8x32xf32>
    %33 = vector.extract_strided_slice %28 {offsets = [0, 64], sizes = [8, 32], strides = [1, 1]} : vector<8x96xf32> to vector<8x32xf32>
    %34 = arith.mulf %32, %17 : vector<8x32xf32>
    %35 = arith.mulf %31, %30 : vector<8x32xf32>
    %36 = arith.addf %34, %35 : vector<8x32xf32>
    %37 = math.tanh %36 : vector<8x32xf32>
    %38 = arith.mulf %33, %37 : vector<8x32xf32>
    %39 = tpu.concatenate %38, %15 in 1 : vector<8x32xf32>, vector<8x32xf32> -> vector<8x64xf32>
    %cst_26 = arith.constant dense<0.000000e+00> : vector<8x128xf32>
    %40 = tpu.matmul %39, %7, %cst_26 {dimension_numbers = #tpu.dot_dimension_numbers<[1], [0], [0], [1], [0, 0, 1, 1], [], []>} : vector<8x64xf32>, vector<64x128xf32>, vector<8x128xf32> -> vector<8x128xf32>
    %41 = arith.addf %40, %10 : vector<8x128xf32>
    %42 = vector.extract_strided_slice %41 {offsets = [0, 0], sizes = [8, 96], strides = [1, 1]} : vector<8x128xf32> to vector<8x96xf32>
    %43 = arith.negf %42 : vector<8x96xf32>
    %44 = math.exp %43 : vector<8x96xf32>
    %cst_27 = arith.constant 1.000000e+00 : f32
    %45 = vector.broadcast %cst_27 : f32 to vector<8x96xf32>
    %46 = arith.addf %45, %44 : vector<8x96xf32>
    %47 = arith.divf %45, %46 : vector<8x96xf32>
    %48 = vector.extract_strided_slice %41 {offsets = [0, 96], sizes = [8, 32], strides = [1, 1]} : vector<8x128xf32> to vector<8x32xf32>
    %49 = math.tanh %48 : vector<8x32xf32>
    %50 = vector.extract_strided_slice %47 {offsets = [0, 0], sizes = [8, 32], strides = [1, 1]} : vector<8x96xf32> to vector<8x32xf32>
    %51 = vector.extract_strided_slice %47 {offsets = [0, 32], sizes = [8, 32], strides = [1, 1]} : vector<8x96xf32> to vector<8x32xf32>
    %52 = vector.extract_strided_slice %47 {offsets = [0, 64], sizes = [8, 32], strides = [1, 1]} : vector<8x96xf32> to vector<8x32xf32>
    %53 = arith.mulf %51, %19 : vector<8x32xf32>
    %54 = arith.mulf %50, %49 : vector<8x32xf32>
    %55 = arith.addf %53, %54 : vector<8x32xf32>
    %56 = math.tanh %55 : vector<8x32xf32>
    %57 = arith.mulf %52, %56 : vector<8x32xf32>
    %58 = vector.extract_strided_slice %5 {offsets = [8, 0], sizes = [8, 128], strides = [1, 1]} : vector<64x128xf32> to vector<8x128xf32>
    %cst_28 = arith.constant dense<0.000000e+00> : vector<8x128xf32>
    %59 = tpu.matmul %38, %6, %cst_28 {dimension_numbers = #tpu.dot_dimension_numbers<[1], [0], [0], [1], [0, 0, 1, 1], [], []>} : vector<8x32xf32>, vector<32x128xf32>, vector<8x128xf32> -> vector<8x128xf32>
    %60 = arith.addf %58, %59 : vector<8x128xf32>
    %61 = vector.extract_strided_slice %60 {offsets = [0, 0], sizes = [8, 96], strides = [1, 1]} : vector<8x128xf32> to vector<8x96xf32>
    %62 = arith.negf %61 : vector<8x96xf32>
    %63 = math.exp %62 : vector<8x96xf32>
    %cst_29 = arith.constant 1.000000e+00 : f32
    %64 = vector.broadcast %cst_29 : f32 to vector<8x96xf32>
    %65 = arith.addf %64, %63 : vector<8x96xf32>
    %66 = arith.divf %64, %65 : vector<8x96xf32>
    %67 = vector.extract_strided_slice %60 {offsets = [0, 96], sizes = [8, 32], strides = [1, 1]} : vector<8x128xf32> to vector<8x32xf32>
    %68 = math.tanh %67 : vector<8x32xf32>
    %69 = vector.extract_strided_slice %66 {offsets = [0, 0], sizes = [8, 32], strides = [1, 1]} : vector<8x96xf32> to vector<8x32xf32>
    %70 = vector.extract_strided_slice %66 {offsets = [0, 32], sizes = [8, 32], strides = [1, 1]} : vector<8x96xf32> to vector<8x32xf32>
    %71 = vector.extract_strided_slice %66 {offsets = [0, 64], sizes = [8, 32], strides = [1, 1]} : vector<8x96xf32> to vector<8x32xf32>
    %72 = arith.mulf %70, %36 : vector<8x32xf32>
    %73 = arith.mulf %69, %68 : vector<8x32xf32>
    %74 = arith.addf %72, %73 : vector<8x32xf32>
    %75 = math.tanh %74 : vector<8x32xf32>
    %76 = arith.mulf %71, %75 : vector<8x32xf32>
    %77 = tpu.concatenate %76, %57 in 1 : vector<8x32xf32>, vector<8x32xf32> -> vector<8x64xf32>
    %cst_30 = arith.constant dense<0.000000e+00> : vector<8x128xf32>
    %78 = tpu.matmul %77, %7, %cst_30 {dimension_numbers = #tpu.dot_dimension_numbers<[1], [0], [0], [1], [0, 0, 1, 1], [], []>} : vector<8x64xf32>, vector<64x128xf32>, vector<8x128xf32> -> vector<8x128xf32>
    %79 = arith.addf %78, %10 : vector<8x128xf32>
    %80 = vector.extract_strided_slice %79 {offsets = [0, 0], sizes = [8, 96], strides = [1, 1]} : vector<8x128xf32> to vector<8x96xf32>
    %81 = arith.negf %80 : vector<8x96xf32>
    %82 = math.exp %81 : vector<8x96xf32>
    %cst_31 = arith.constant 1.000000e+00 : f32
    %83 = vector.broadcast %cst_31 : f32 to vector<8x96xf32>
    %84 = arith.addf %83, %82 : vector<8x96xf32>
    %85 = arith.divf %83, %84 : vector<8x96xf32>
    %86 = vector.extract_strided_slice %79 {offsets = [0, 96], sizes = [8, 32], strides = [1, 1]} : vector<8x128xf32> to vector<8x32xf32>
    %87 = math.tanh %86 : vector<8x32xf32>
    %88 = vector.extract_strided_slice %85 {offsets = [0, 0], sizes = [8, 32], strides = [1, 1]} : vector<8x96xf32> to vector<8x32xf32>
    %89 = vector.extract_strided_slice %85 {offsets = [0, 32], sizes = [8, 32], strides = [1, 1]} : vector<8x96xf32> to vector<8x32xf32>
    %90 = vector.extract_strided_slice %85 {offsets = [0, 64], sizes = [8, 32], strides = [1, 1]} : vector<8x96xf32> to vector<8x32xf32>
    %91 = arith.mulf %89, %55 : vector<8x32xf32>
    %92 = arith.mulf %88, %87 : vector<8x32xf32>
    %93 = arith.addf %91, %92 : vector<8x32xf32>
    %94 = math.tanh %93 : vector<8x32xf32>
    %95 = arith.mulf %90, %94 : vector<8x32xf32>
    %96 = vector.extract_strided_slice %5 {offsets = [16, 0], sizes = [8, 128], strides = [1, 1]} : vector<64x128xf32> to vector<8x128xf32>
    %cst_32 = arith.constant dense<0.000000e+00> : vector<8x128xf32>
    %97 = tpu.matmul %76, %6, %cst_32 {dimension_numbers = #tpu.dot_dimension_numbers<[1], [0], [0], [1], [0, 0, 1, 1], [], []>} : vector<8x32xf32>, vector<32x128xf32>, vector<8x128xf32> -> vector<8x128xf32>
    %98 = arith.addf %96, %97 : vector<8x128xf32>
    %99 = vector.extract_strided_slice %98 {offsets = [0, 0], sizes = [8, 96], strides = [1, 1]} : vector<8x128xf32> to vector<8x96xf32>
    %100 = arith.negf %99 : vector<8x96xf32>
    %101 = math.exp %100 : vector<8x96xf32>
    %cst_33 = arith.constant 1.000000e+00 : f32
    %102 = vector.broadcast %cst_33 : f32 to vector<8x96xf32>
    %103 = arith.addf %102, %101 : vector<8x96xf32>
    %104 = arith.divf %102, %103 : vector<8x96xf32>
    %105 = vector.extract_strided_slice %98 {offsets = [0, 96], sizes = [8, 32], strides = [1, 1]} : vector<8x128xf32> to vector<8x32xf32>
    %106 = math.tanh %105 : vector<8x32xf32>
    %107 = vector.extract_strided_slice %104 {offsets = [0, 0], sizes = [8, 32], strides = [1, 1]} : vector<8x96xf32> to vector<8x32xf32>
    %108 = vector.extract_strided_slice %104 {offsets = [0, 32], sizes = [8, 32], strides = [1, 1]} : vector<8x96xf32> to vector<8x32xf32>
    %109 = vector.extract_strided_slice %104 {offsets = [0, 64], sizes = [8, 32], strides = [1, 1]} : vector<8x96xf32> to vector<8x32xf32>
    %110 = arith.mulf %108, %74 : vector<8x32xf32>
    %111 = arith.mulf %107, %106 : vector<8x32xf32>
    %112 = arith.addf %110, %111 : vector<8x32xf32>
    %113 = math.tanh %112 : vector<8x32xf32>
    %114 = arith.mulf %109, %113 : vector<8x32xf32>
    %115 = tpu.concatenate %114, %95 in 1 : vector<8x32xf32>, vector<8x32xf32> -> vector<8x64xf32>
    %cst_34 = arith.constant dense<0.000000e+00> : vector<8x128xf32>
    %116 = tpu.matmul %115, %7, %cst_34 {dimension_numbers = #tpu.dot_dimension_numbers<[1], [0], [0], [1], [0, 0, 1, 1], [], []>} : vector<8x64xf32>, vector<64x128xf32>, vector<8x128xf32> -> vector<8x128xf32>
    %117 = arith.addf %116, %10 : vector<8x128xf32>
    %118 = vector.extract_strided_slice %117 {offsets = [0, 0], sizes = [8, 96], strides = [1, 1]} : vector<8x128xf32> to vector<8x96xf32>
    %119 = arith.negf %118 : vector<8x96xf32>
    %120 = math.exp %119 : vector<8x96xf32>
    %cst_35 = arith.constant 1.000000e+00 : f32
    %121 = vector.broadcast %cst_35 : f32 to vector<8x96xf32>
    %122 = arith.addf %121, %120 : vector<8x96xf32>
    %123 = arith.divf %121, %122 : vector<8x96xf32>
    %124 = vector.extract_strided_slice %117 {offsets = [0, 96], sizes = [8, 32], strides = [1, 1]} : vector<8x128xf32> to vector<8x32xf32>
    %125 = math.tanh %124 : vector<8x32xf32>
    %126 = vector.extract_strided_slice %123 {offsets = [0, 0], sizes = [8, 32], strides = [1, 1]} : vector<8x96xf32> to vector<8x32xf32>
    %127 = vector.extract_strided_slice %123 {offsets = [0, 32], sizes = [8, 32], strides = [1, 1]} : vector<8x96xf32> to vector<8x32xf32>
    %128 = vector.extract_strided_slice %123 {offsets = [0, 64], sizes = [8, 32], strides = [1, 1]} : vector<8x96xf32> to vector<8x32xf32>
    %129 = arith.mulf %127, %93 : vector<8x32xf32>
    %130 = arith.mulf %126, %125 : vector<8x32xf32>
    %131 = arith.addf %129, %130 : vector<8x32xf32>
    %132 = math.tanh %131 : vector<8x32xf32>
    %133 = arith.mulf %128, %132 : vector<8x32xf32>
    %134 = vector.extract_strided_slice %5 {offsets = [24, 0], sizes = [8, 128], strides = [1, 1]} : vector<64x128xf32> to vector<8x128xf32>
    %cst_36 = arith.constant dense<0.000000e+00> : vector<8x128xf32>
    %135 = tpu.matmul %114, %6, %cst_36 {dimension_numbers = #tpu.dot_dimension_numbers<[1], [0], [0], [1], [0, 0, 1, 1], [], []>} : vector<8x32xf32>, vector<32x128xf32>, vector<8x128xf32> -> vector<8x128xf32>
    %136 = arith.addf %134, %135 : vector<8x128xf32>
    %137 = vector.extract_strided_slice %136 {offsets = [0, 0], sizes = [8, 96], strides = [1, 1]} : vector<8x128xf32> to vector<8x96xf32>
    %138 = arith.negf %137 : vector<8x96xf32>
    %139 = math.exp %138 : vector<8x96xf32>
    %cst_37 = arith.constant 1.000000e+00 : f32
    %140 = vector.broadcast %cst_37 : f32 to vector<8x96xf32>
    %141 = arith.addf %140, %139 : vector<8x96xf32>
    %142 = arith.divf %140, %141 : vector<8x96xf32>
    %143 = vector.extract_strided_slice %136 {offsets = [0, 96], sizes = [8, 32], strides = [1, 1]} : vector<8x128xf32> to vector<8x32xf32>
    %144 = math.tanh %143 : vector<8x32xf32>
    %145 = vector.extract_strided_slice %142 {offsets = [0, 0], sizes = [8, 32], strides = [1, 1]} : vector<8x96xf32> to vector<8x32xf32>
    %146 = vector.extract_strided_slice %142 {offsets = [0, 32], sizes = [8, 32], strides = [1, 1]} : vector<8x96xf32> to vector<8x32xf32>
    %147 = vector.extract_strided_slice %142 {offsets = [0, 64], sizes = [8, 32], strides = [1, 1]} : vector<8x96xf32> to vector<8x32xf32>
    %148 = arith.mulf %146, %112 : vector<8x32xf32>
    %149 = arith.mulf %145, %144 : vector<8x32xf32>
    %150 = arith.addf %148, %149 : vector<8x32xf32>
    %151 = math.tanh %150 : vector<8x32xf32>
    %152 = arith.mulf %147, %151 : vector<8x32xf32>
    %153 = tpu.concatenate %152, %133 in 1 : vector<8x32xf32>, vector<8x32xf32> -> vector<8x64xf32>
    %cst_38 = arith.constant dense<0.000000e+00> : vector<8x128xf32>
    %154 = tpu.matmul %153, %7, %cst_38 {dimension_numbers = #tpu.dot_dimension_numbers<[1], [0], [0], [1], [0, 0, 1, 1], [], []>} : vector<8x64xf32>, vector<64x128xf32>, vector<8x128xf32> -> vector<8x128xf32>
    %155 = arith.addf %154, %10 : vector<8x128xf32>
    %156 = vector.extract_strided_slice %155 {offsets = [0, 0], sizes = [8, 96], strides = [1, 1]} : vector<8x128xf32> to vector<8x96xf32>
    %157 = arith.negf %156 : vector<8x96xf32>
    %158 = math.exp %157 : vector<8x96xf32>
    %cst_39 = arith.constant 1.000000e+00 : f32
    %159 = vector.broadcast %cst_39 : f32 to vector<8x96xf32>
    %160 = arith.addf %159, %158 : vector<8x96xf32>
    %161 = arith.divf %159, %160 : vector<8x96xf32>
    %162 = vector.extract_strided_slice %155 {offsets = [0, 96], sizes = [8, 32], strides = [1, 1]} : vector<8x128xf32> to vector<8x32xf32>
    %163 = math.tanh %162 : vector<8x32xf32>
    %164 = vector.extract_strided_slice %161 {offsets = [0, 0], sizes = [8, 32], strides = [1, 1]} : vector<8x96xf32> to vector<8x32xf32>
    %165 = vector.extract_strided_slice %161 {offsets = [0, 32], sizes = [8, 32], strides = [1, 1]} : vector<8x96xf32> to vector<8x32xf32>
    %166 = vector.extract_strided_slice %161 {offsets = [0, 64], sizes = [8, 32], strides = [1, 1]} : vector<8x96xf32> to vector<8x32xf32>
    %167 = arith.mulf %165, %131 : vector<8x32xf32>
    %168 = arith.mulf %164, %163 : vector<8x32xf32>
    %169 = arith.addf %167, %168 : vector<8x32xf32>
    %170 = math.tanh %169 : vector<8x32xf32>
    %171 = arith.mulf %166, %170 : vector<8x32xf32>
    %172 = vector.extract_strided_slice %5 {offsets = [32, 0], sizes = [8, 128], strides = [1, 1]} : vector<64x128xf32> to vector<8x128xf32>
    %cst_40 = arith.constant dense<0.000000e+00> : vector<8x128xf32>
    %173 = tpu.matmul %152, %6, %cst_40 {dimension_numbers = #tpu.dot_dimension_numbers<[1], [0], [0], [1], [0, 0, 1, 1], [], []>} : vector<8x32xf32>, vector<32x128xf32>, vector<8x128xf32> -> vector<8x128xf32>
    %174 = arith.addf %172, %173 : vector<8x128xf32>
    %175 = vector.extract_strided_slice %174 {offsets = [0, 0], sizes = [8, 96], strides = [1, 1]} : vector<8x128xf32> to vector<8x96xf32>
    %176 = arith.negf %175 : vector<8x96xf32>
    %177 = math.exp %176 : vector<8x96xf32>
    %cst_41 = arith.constant 1.000000e+00 : f32
    %178 = vector.broadcast %cst_41 : f32 to vector<8x96xf32>
    %179 = arith.addf %178, %177 : vector<8x96xf32>
    %180 = arith.divf %178, %179 : vector<8x96xf32>
    %181 = vector.extract_strided_slice %174 {offsets = [0, 96], sizes = [8, 32], strides = [1, 1]} : vector<8x128xf32> to vector<8x32xf32>
    %182 = math.tanh %181 : vector<8x32xf32>
    %183 = vector.extract_strided_slice %180 {offsets = [0, 0], sizes = [8, 32], strides = [1, 1]} : vector<8x96xf32> to vector<8x32xf32>
    %184 = vector.extract_strided_slice %180 {offsets = [0, 32], sizes = [8, 32], strides = [1, 1]} : vector<8x96xf32> to vector<8x32xf32>
    %185 = vector.extract_strided_slice %180 {offsets = [0, 64], sizes = [8, 32], strides = [1, 1]} : vector<8x96xf32> to vector<8x32xf32>
    %186 = arith.mulf %184, %150 : vector<8x32xf32>
    %187 = arith.mulf %183, %182 : vector<8x32xf32>
    %188 = arith.addf %186, %187 : vector<8x32xf32>
    %189 = math.tanh %188 : vector<8x32xf32>
    %190 = arith.mulf %185, %189 : vector<8x32xf32>
    %191 = tpu.concatenate %190, %171 in 1 : vector<8x32xf32>, vector<8x32xf32> -> vector<8x64xf32>
    %cst_42 = arith.constant dense<0.000000e+00> : vector<8x128xf32>
    %192 = tpu.matmul %191, %7, %cst_42 {dimension_numbers = #tpu.dot_dimension_numbers<[1], [0], [0], [1], [0, 0, 1, 1], [], []>} : vector<8x64xf32>, vector<64x128xf32>, vector<8x128xf32> -> vector<8x128xf32>
    %193 = arith.addf %192, %10 : vector<8x128xf32>
    %194 = vector.extract_strided_slice %193 {offsets = [0, 0], sizes = [8, 96], strides = [1, 1]} : vector<8x128xf32> to vector<8x96xf32>
    %195 = arith.negf %194 : vector<8x96xf32>
    %196 = math.exp %195 : vector<8x96xf32>
    %cst_43 = arith.constant 1.000000e+00 : f32
    %197 = vector.broadcast %cst_43 : f32 to vector<8x96xf32>
    %198 = arith.addf %197, %196 : vector<8x96xf32>
    %199 = arith.divf %197, %198 : vector<8x96xf32>
    %200 = vector.extract_strided_slice %193 {offsets = [0, 96], sizes = [8, 32], strides = [1, 1]} : vector<8x128xf32> to vector<8x32xf32>
    %201 = math.tanh %200 : vector<8x32xf32>
    %202 = vector.extract_strided_slice %199 {offsets = [0, 0], sizes = [8, 32], strides = [1, 1]} : vector<8x96xf32> to vector<8x32xf32>
    %203 = vector.extract_strided_slice %199 {offsets = [0, 32], sizes = [8, 32], strides = [1, 1]} : vector<8x96xf32> to vector<8x32xf32>
    %204 = vector.extract_strided_slice %199 {offsets = [0, 64], sizes = [8, 32], strides = [1, 1]} : vector<8x96xf32> to vector<8x32xf32>
    %205 = arith.mulf %203, %169 : vector<8x32xf32>
    %206 = arith.mulf %202, %201 : vector<8x32xf32>
    %207 = arith.addf %205, %206 : vector<8x32xf32>
    %208 = math.tanh %207 : vector<8x32xf32>
    %209 = arith.mulf %204, %208 : vector<8x32xf32>
    %210 = vector.extract_strided_slice %5 {offsets = [40, 0], sizes = [8, 128], strides = [1, 1]} : vector<64x128xf32> to vector<8x128xf32>
    %cst_44 = arith.constant dense<0.000000e+00> : vector<8x128xf32>
    %211 = tpu.matmul %190, %6, %cst_44 {dimension_numbers = #tpu.dot_dimension_numbers<[1], [0], [0], [1], [0, 0, 1, 1], [], []>} : vector<8x32xf32>, vector<32x128xf32>, vector<8x128xf32> -> vector<8x128xf32>
    %212 = arith.addf %210, %211 : vector<8x128xf32>
    %213 = vector.extract_strided_slice %212 {offsets = [0, 0], sizes = [8, 96], strides = [1, 1]} : vector<8x128xf32> to vector<8x96xf32>
    %214 = arith.negf %213 : vector<8x96xf32>
    %215 = math.exp %214 : vector<8x96xf32>
    %cst_45 = arith.constant 1.000000e+00 : f32
    %216 = vector.broadcast %cst_45 : f32 to vector<8x96xf32>
    %217 = arith.addf %216, %215 : vector<8x96xf32>
    %218 = arith.divf %216, %217 : vector<8x96xf32>
    %219 = vector.extract_strided_slice %212 {offsets = [0, 96], sizes = [8, 32], strides = [1, 1]} : vector<8x128xf32> to vector<8x32xf32>
    %220 = math.tanh %219 : vector<8x32xf32>
    %221 = vector.extract_strided_slice %218 {offsets = [0, 0], sizes = [8, 32], strides = [1, 1]} : vector<8x96xf32> to vector<8x32xf32>
    %222 = vector.extract_strided_slice %218 {offsets = [0, 32], sizes = [8, 32], strides = [1, 1]} : vector<8x96xf32> to vector<8x32xf32>
    %223 = vector.extract_strided_slice %218 {offsets = [0, 64], sizes = [8, 32], strides = [1, 1]} : vector<8x96xf32> to vector<8x32xf32>
    %224 = arith.mulf %222, %188 : vector<8x32xf32>
    %225 = arith.mulf %221, %220 : vector<8x32xf32>
    %226 = arith.addf %224, %225 : vector<8x32xf32>
    %227 = math.tanh %226 : vector<8x32xf32>
    %228 = arith.mulf %223, %227 : vector<8x32xf32>
    %229 = tpu.concatenate %228, %209 in 1 : vector<8x32xf32>, vector<8x32xf32> -> vector<8x64xf32>
    %cst_46 = arith.constant dense<0.000000e+00> : vector<8x128xf32>
    %230 = tpu.matmul %229, %7, %cst_46 {dimension_numbers = #tpu.dot_dimension_numbers<[1], [0], [0], [1], [0, 0, 1, 1], [], []>} : vector<8x64xf32>, vector<64x128xf32>, vector<8x128xf32> -> vector<8x128xf32>
    %231 = arith.addf %230, %10 : vector<8x128xf32>
    %232 = vector.extract_strided_slice %231 {offsets = [0, 0], sizes = [8, 96], strides = [1, 1]} : vector<8x128xf32> to vector<8x96xf32>
    %233 = arith.negf %232 : vector<8x96xf32>
    %234 = math.exp %233 : vector<8x96xf32>
    %cst_47 = arith.constant 1.000000e+00 : f32
    %235 = vector.broadcast %cst_47 : f32 to vector<8x96xf32>
    %236 = arith.addf %235, %234 : vector<8x96xf32>
    %237 = arith.divf %235, %236 : vector<8x96xf32>
    %238 = vector.extract_strided_slice %231 {offsets = [0, 96], sizes = [8, 32], strides = [1, 1]} : vector<8x128xf32> to vector<8x32xf32>
    %239 = math.tanh %238 : vector<8x32xf32>
    %240 = vector.extract_strided_slice %237 {offsets = [0, 0], sizes = [8, 32], strides = [1, 1]} : vector<8x96xf32> to vector<8x32xf32>
    %241 = vector.extract_strided_slice %237 {offsets = [0, 32], sizes = [8, 32], strides = [1, 1]} : vector<8x96xf32> to vector<8x32xf32>
    %242 = vector.extract_strided_slice %237 {offsets = [0, 64], sizes = [8, 32], strides = [1, 1]} : vector<8x96xf32> to vector<8x32xf32>
    %243 = arith.mulf %241, %207 : vector<8x32xf32>
    %244 = arith.mulf %240, %239 : vector<8x32xf32>
    %245 = arith.addf %243, %244 : vector<8x32xf32>
    %246 = math.tanh %245 : vector<8x32xf32>
    %247 = arith.mulf %242, %246 : vector<8x32xf32>
    %248 = vector.extract_strided_slice %5 {offsets = [48, 0], sizes = [8, 128], strides = [1, 1]} : vector<64x128xf32> to vector<8x128xf32>
    %cst_48 = arith.constant dense<0.000000e+00> : vector<8x128xf32>
    %249 = tpu.matmul %228, %6, %cst_48 {dimension_numbers = #tpu.dot_dimension_numbers<[1], [0], [0], [1], [0, 0, 1, 1], [], []>} : vector<8x32xf32>, vector<32x128xf32>, vector<8x128xf32> -> vector<8x128xf32>
    %250 = arith.addf %248, %249 : vector<8x128xf32>
    %251 = vector.extract_strided_slice %250 {offsets = [0, 0], sizes = [8, 96], strides = [1, 1]} : vector<8x128xf32> to vector<8x96xf32>
    %252 = arith.negf %251 : vector<8x96xf32>
    %253 = math.exp %252 : vector<8x96xf32>
    %cst_49 = arith.constant 1.000000e+00 : f32
    %254 = vector.broadcast %cst_49 : f32 to vector<8x96xf32>
    %255 = arith.addf %254, %253 : vector<8x96xf32>
    %256 = arith.divf %254, %255 : vector<8x96xf32>
    %257 = vector.extract_strided_slice %250 {offsets = [0, 96], sizes = [8, 32], strides = [1, 1]} : vector<8x128xf32> to vector<8x32xf32>
    %258 = math.tanh %257 : vector<8x32xf32>
    %259 = vector.extract_strided_slice %256 {offsets = [0, 0], sizes = [8, 32], strides = [1, 1]} : vector<8x96xf32> to vector<8x32xf32>
    %260 = vector.extract_strided_slice %256 {offsets = [0, 32], sizes = [8, 32], strides = [1, 1]} : vector<8x96xf32> to vector<8x32xf32>
    %261 = vector.extract_strided_slice %256 {offsets = [0, 64], sizes = [8, 32], strides = [1, 1]} : vector<8x96xf32> to vector<8x32xf32>
    %262 = arith.mulf %260, %226 : vector<8x32xf32>
    %263 = arith.mulf %259, %258 : vector<8x32xf32>
    %264 = arith.addf %262, %263 : vector<8x32xf32>
    %265 = math.tanh %264 : vector<8x32xf32>
    %266 = arith.mulf %261, %265 : vector<8x32xf32>
    %267 = tpu.concatenate %266, %247 in 1 : vector<8x32xf32>, vector<8x32xf32> -> vector<8x64xf32>
    %cst_50 = arith.constant dense<0.000000e+00> : vector<8x128xf32>
    %268 = tpu.matmul %267, %7, %cst_50 {dimension_numbers = #tpu.dot_dimension_numbers<[1], [0], [0], [1], [0, 0, 1, 1], [], []>} : vector<8x64xf32>, vector<64x128xf32>, vector<8x128xf32> -> vector<8x128xf32>
    %269 = arith.addf %268, %10 : vector<8x128xf32>
    %270 = vector.extract_strided_slice %269 {offsets = [0, 0], sizes = [8, 96], strides = [1, 1]} : vector<8x128xf32> to vector<8x96xf32>
    %271 = arith.negf %270 : vector<8x96xf32>
    %272 = math.exp %271 : vector<8x96xf32>
    %cst_51 = arith.constant 1.000000e+00 : f32
    %273 = vector.broadcast %cst_51 : f32 to vector<8x96xf32>
    %274 = arith.addf %273, %272 : vector<8x96xf32>
    %275 = arith.divf %273, %274 : vector<8x96xf32>
    %276 = vector.extract_strided_slice %269 {offsets = [0, 96], sizes = [8, 32], strides = [1, 1]} : vector<8x128xf32> to vector<8x32xf32>
    %277 = math.tanh %276 : vector<8x32xf32>
    %278 = vector.extract_strided_slice %275 {offsets = [0, 0], sizes = [8, 32], strides = [1, 1]} : vector<8x96xf32> to vector<8x32xf32>
    %279 = vector.extract_strided_slice %275 {offsets = [0, 32], sizes = [8, 32], strides = [1, 1]} : vector<8x96xf32> to vector<8x32xf32>
    %280 = vector.extract_strided_slice %275 {offsets = [0, 64], sizes = [8, 32], strides = [1, 1]} : vector<8x96xf32> to vector<8x32xf32>
    %281 = arith.mulf %279, %245 : vector<8x32xf32>
    %282 = arith.mulf %278, %277 : vector<8x32xf32>
    %283 = arith.addf %281, %282 : vector<8x32xf32>
    %284 = math.tanh %283 : vector<8x32xf32>
    %285 = arith.mulf %280, %284 : vector<8x32xf32>
    %286 = vector.extract_strided_slice %5 {offsets = [56, 0], sizes = [8, 128], strides = [1, 1]} : vector<64x128xf32> to vector<8x128xf32>
    %cst_52 = arith.constant dense<0.000000e+00> : vector<8x128xf32>
    %287 = tpu.matmul %266, %6, %cst_52 {dimension_numbers = #tpu.dot_dimension_numbers<[1], [0], [0], [1], [0, 0, 1, 1], [], []>} : vector<8x32xf32>, vector<32x128xf32>, vector<8x128xf32> -> vector<8x128xf32>
    %288 = arith.addf %286, %287 : vector<8x128xf32>
    %289 = vector.extract_strided_slice %288 {offsets = [0, 0], sizes = [8, 96], strides = [1, 1]} : vector<8x128xf32> to vector<8x96xf32>
    %290 = arith.negf %289 : vector<8x96xf32>
    %291 = math.exp %290 : vector<8x96xf32>
    %cst_53 = arith.constant 1.000000e+00 : f32
    %292 = vector.broadcast %cst_53 : f32 to vector<8x96xf32>
    %293 = arith.addf %292, %291 : vector<8x96xf32>
    %294 = arith.divf %292, %293 : vector<8x96xf32>
    %295 = vector.extract_strided_slice %288 {offsets = [0, 96], sizes = [8, 32], strides = [1, 1]} : vector<8x128xf32> to vector<8x32xf32>
    %296 = math.tanh %295 : vector<8x32xf32>
    %297 = vector.extract_strided_slice %294 {offsets = [0, 0], sizes = [8, 32], strides = [1, 1]} : vector<8x96xf32> to vector<8x32xf32>
    %298 = vector.extract_strided_slice %294 {offsets = [0, 32], sizes = [8, 32], strides = [1, 1]} : vector<8x96xf32> to vector<8x32xf32>
    %299 = vector.extract_strided_slice %294 {offsets = [0, 64], sizes = [8, 32], strides = [1, 1]} : vector<8x96xf32> to vector<8x32xf32>
    %300 = arith.mulf %298, %264 : vector<8x32xf32>
    %301 = arith.mulf %297, %296 : vector<8x32xf32>
    %302 = arith.addf %300, %301 : vector<8x32xf32>
    %303 = math.tanh %302 : vector<8x32xf32>
    %304 = arith.mulf %299, %303 : vector<8x32xf32>
    %305 = tpu.concatenate %304, %285 in 1 : vector<8x32xf32>, vector<8x32xf32> -> vector<8x64xf32>
    %cst_54 = arith.constant dense<0.000000e+00> : vector<8x128xf32>
    %306 = tpu.matmul %305, %7, %cst_54 {dimension_numbers = #tpu.dot_dimension_numbers<[1], [0], [0], [1], [0, 0, 1, 1], [], []>} : vector<8x64xf32>, vector<64x128xf32>, vector<8x128xf32> -> vector<8x128xf32>
    %307 = arith.addf %306, %10 : vector<8x128xf32>
    %308 = vector.extract_strided_slice %307 {offsets = [0, 0], sizes = [8, 96], strides = [1, 1]} : vector<8x128xf32> to vector<8x96xf32>
    %309 = arith.negf %308 : vector<8x96xf32>
    %310 = math.exp %309 : vector<8x96xf32>
    %cst_55 = arith.constant 1.000000e+00 : f32
    %311 = vector.broadcast %cst_55 : f32 to vector<8x96xf32>
    %312 = arith.addf %311, %310 : vector<8x96xf32>
    %313 = arith.divf %311, %312 : vector<8x96xf32>
    %314 = vector.extract_strided_slice %307 {offsets = [0, 96], sizes = [8, 32], strides = [1, 1]} : vector<8x128xf32> to vector<8x32xf32>
    %315 = math.tanh %314 : vector<8x32xf32>
    %316 = vector.extract_strided_slice %313 {offsets = [0, 0], sizes = [8, 32], strides = [1, 1]} : vector<8x96xf32> to vector<8x32xf32>
    %317 = vector.extract_strided_slice %313 {offsets = [0, 32], sizes = [8, 32], strides = [1, 1]} : vector<8x96xf32> to vector<8x32xf32>
    %318 = vector.extract_strided_slice %313 {offsets = [0, 64], sizes = [8, 32], strides = [1, 1]} : vector<8x96xf32> to vector<8x32xf32>
    %319 = arith.mulf %317, %283 : vector<8x32xf32>
    %320 = arith.mulf %316, %315 : vector<8x32xf32>
    %321 = arith.addf %319, %320 : vector<8x32xf32>
    %322 = math.tanh %321 : vector<8x32xf32>
    %323 = arith.mulf %318, %322 : vector<8x32xf32>
    %324 = tpu.concatenate %57, %95, %133, %171, %209, %247, %285, %323 in 0 : vector<8x32xf32>, vector<8x32xf32>, vector<8x32xf32>, vector<8x32xf32>, vector<8x32xf32>, vector<8x32xf32>, vector<8x32xf32>, vector<8x32xf32> -> vector<64x32xf32>
    %cst_56 = arith.constant dense<0.000000e+00> : vector<64x128xf32>
    %325 = tpu.matmul %324, %11, %cst_56 {dimension_numbers = #tpu.dot_dimension_numbers<[1], [0], [0], [1], [0, 0, 1, 1], [], []>} : vector<64x32xf32>, vector<32x128xf32>, vector<64x128xf32> -> vector<64x128xf32>
    %c0_57 = arith.constant 0 : index
    %c0_58 = arith.constant 0 : index
    %326 = vector.load %arg7[%c0_57, %c0_58] : memref<1x128xf32, #tpu.memory_space<vmem>>, vector<1x128xf32>
    %327 = vector.broadcast %326 : vector<1x128xf32> to vector<64x128xf32>
    %328 = arith.addf %325, %327 : vector<64x128xf32>
    %c0_59 = arith.constant 0 : index
    %c0_60 = arith.constant 0 : index
    %329 = vector.load %arg10[%c0_59, %c0_60] : memref<64x128xf32, #tpu.memory_space<vmem>>, vector<64x128xf32>
    tpu.vector_store %arg10[%c0_59, %c0_60], %328 {strides = array<i32>} : memref<64x128xf32, #tpu.memory_space<vmem>>, vector<64x128xf32>,
    %c0_61 = arith.constant 0 : index
    %c0_62 = arith.constant 0 : index
    %c0_63 = arith.constant 0 : index
    %330 = vector.load %arg11[%c0_61, %c0_62, %c0_63] : memref<2x8x32xf32, #tpu.memory_space<vmem>>, vector<1x8x32xf32>
    %331 = vector.shape_cast %330 : vector<1x8x32xf32> to vector<8x32xf32>
    %332 = vector.shape_cast %304 : vector<8x32xf32> to vector<1x8x32xf32>
    tpu.vector_store %arg11[%c0_61, %c0_62, %c0_63], %332 {strides = array<i32>} : memref<2x8x32xf32, #tpu.memory_space<vmem>>, vector<1x8x32xf32>,
    %c0_64 = arith.constant 0 : index
    %c0_65 = arith.constant 0 : index
    %c0_66 = arith.constant 0 : index
    %333 = vector.load %arg12[%c0_64, %c0_65, %c0_66] : memref<2x8x32xf32, #tpu.memory_space<vmem>>, vector<1x8x32xf32>
    %334 = vector.shape_cast %333 : vector<1x8x32xf32> to vector<8x32xf32>
    %335 = vector.shape_cast %302 : vector<8x32xf32> to vector<1x8x32xf32>
    tpu.vector_store %arg12[%c0_64, %c0_65, %c0_66], %335 {strides = array<i32>} : memref<2x8x32xf32, #tpu.memory_space<vmem>>, vector<1x8x32xf32>,
    %c1_67 = arith.constant 1 : index
    %c0_68 = arith.constant 0 : index
    %c0_69 = arith.constant 0 : index
    %336 = vector.load %arg11[%c1_67, %c0_68, %c0_69] : memref<2x8x32xf32, #tpu.memory_space<vmem>>, vector<1x8x32xf32>
    %337 = vector.shape_cast %336 : vector<1x8x32xf32> to vector<8x32xf32>
    %338 = vector.shape_cast %323 : vector<8x32xf32> to vector<1x8x32xf32>
    tpu.vector_store %arg11[%c1_67, %c0_68, %c0_69], %338 {strides = array<i32>} : memref<2x8x32xf32, #tpu.memory_space<vmem>>, vector<1x8x32xf32>,
    %c1_70 = arith.constant 1 : index
    %c0_71 = arith.constant 0 : index
    %c0_72 = arith.constant 0 : index
    %339 = vector.load %arg12[%c1_70, %c0_71, %c0_72] : memref<2x8x32xf32, #tpu.memory_space<vmem>>, vector<1x8x32xf32>
    %340 = vector.shape_cast %339 : vector<1x8x32xf32> to vector<8x32xf32>
    %341 = vector.shape_cast %321 : vector<8x32xf32> to vector<1x8x32xf32>
    tpu.vector_store %arg12[%c1_70, %c0_71, %c0_72], %341 {strides = array<i32>} : memref<2x8x32xf32, #tpu.memory_space<vmem>>, vector<1x8x32xf32>,
    return
  }
}

</mosaic_0001>

<bundles_post_ra>
// kernel: nnlm_forward.1
= control target key start
LH: loop header
LB: loop body
LE: loop exit
PB: predicated region body
PF: predicated region fallthrough
CT: control target
= control target key end

     0   :  { %vm55_vm0 = vcmask 130048   ;;  %v2784_v0 = vmov 0.0|0.0   ;;  %vm2785_vm1 = vmmov 0   ;;  %v2786_v4 = vmov 0.0   ;;  %s2787_s21 = smov 32   ;;  %s3359_s1 = inlined_call_operand.vmem [shape: f32[16,128], index: 1, kind: input, shape index: {}]   ;;  %s3360_s2 = inlined_call_operand.vmem [shape: f32[32,128], index: 2, kind: input, shape index: {}]   ;;  %s3361_s0 = inlined_call_operand.vmem [shape: f32[64,16], index: 0, kind: input, shape index: {}]   ;;  %s3362_s8 = inlined_call_operand.vmem [shape: f32[2,8,32], index: 8, kind: input, shape index: {}]   ;;  %s3363_s3 = inlined_call_operand.vmem [shape: f32[1,128], index: 3, kind: input, shape index: {}]   ;;  %s3364_s9 = inlined_call_operand.vmem [shape: f32[2,8,32], index: 9, kind: input, shape index: {}]   ;;  %s3365_s4 = inlined_call_operand.vmem [shape: f32[64,128], index: 4, kind: input, shape index: {}]   ;;  %s3366_s5 = inlined_call_operand.vmem [shape: f32[1,128], index: 5, kind: input, shape index: {}]   ;;  %s3367_s11 = inlined_call_operand.vmem [shape: f32[2,8,32], index: 11, kind: output, shape index: {1}]   ;;  %s3368_s6 = inlined_call_operand.vmem [shape: f32[32,128], index: 6, kind: input, shape index: {}]   ;;  %s3369_s12 = inlined_call_operand.vmem [shape: f32[2,8,32], index: 12, kind: output, shape index: {2}]   ;;  %s3370_s7 = inlined_call_operand.vmem [shape: f32[1,128], index: 7, kind: input, shape index: {}]   ;;  %s3371_s10 = inlined_call_operand.vmem [shape: f32[64,128], index: 10, kind: output, shape index: {0}]  }
   0x1   :  { %2498 = vmatprep.subr.bf16.mxu1 %v2784_v0  ;;  %v46_v1 = vld [vmem:[%s3359_s1] sm:$0xff]  ;;  %v47_v2 = vld [vmem:[%s3359_s1 + $0x8] sm:$0xff]  ;;  %2242 = vmatprep.mubr.msk.f32.mxu1 %vm2785_vm1, %v2786_v4  ;;  %v187_v9 = vld [vmem:[%s3360_s2 + $0x10] sm:$0xff]  ;;  %vm214_vm2 = vcmask 261120   ;;  %vm326_vm3 = vcmask 523264  }
   0x2   :  { %v185_v3 = vld [vmem:[%s3360_s2] sm:$0xff]  ;;  %v2494_v5 = vpack.c.bf16 %v47_v2, %v46_v1  ;;  %v186_v6 = vld [vmem:[%s3360_s2 + $0x8] sm:$0xff]  ;;  %v188_v10 = vld [vmem:[%s3360_s2 + $0x18] sm:$0xff] }
   0x3   :  { %v38_v7 = vld [vmem:[%s3361_s0] sm:$0xff]  ;;  %v2873_v8 = vpack.c.bf16 %v186_v6, %v185_v3  ;;  %v39_v11 = vld [vmem:[%s3361_s0 + $0x8] sm:$0xff]  ;;  %v2886_v12 = vpack.c.bf16 %v188_v10, %v187_v9  ;;  %v40_v33 = vld [vmem:[%s3361_s0 + $0x10] sm:$0xff] }
   0x4   :  { %2222 = vmatprep.mubr.msk.f32.mxu0 %vm55_vm0, %v38_v7  ;;  %2495 = vmatprep.subr.bf16.mxu0 %v2494_v5  ;;  %v208_v13 = vld [vmem:[%s3362_s8] sm:$0xff]  ;;  %v41_v34 = vld [vmem:[%s3361_s0 + $0x18] sm:$0xff]  ;;  %v190_v37 = vld [vmem:[%s3365_s4 + $0x8] sm:$0xff] }
   0x5   :  { %2500 = vmatpush3.bf16.msra.mxu1 %v2873_v8  ;;  %2497 = vmatpush3.bf16.msra.mxu0 %v2494_v5  ;;  %v2906_v14 = vld [vmem:[%s3363_s3] ss:$0 sm:$0xff]  ;;  %v191_v38 = vld [vmem:[%s3365_s4 + $0x10] sm:$0xff]  ;;  %v192_v40 = vld [vmem:[%s3365_s4 + $0x18] sm:$0xff] }
   0x6   :  { %2501 = vmatprep.subr.bf16.mxu1 %v2784_v0  ;;  %2504 = vmatprep.subr.bf16.mxu0 %v2784_v0  ;;  %v211_v22 = vld [vmem:[%s3364_s9] sm:$0xff]  ;;  %v43_v41 = vld [vmem:[%s3361_s0 + $0x28] sm:$0xff]  ;;  %v2950_v42 = vpack.c.bf16 %v192_v40, %v191_v38  ;;  %v44_v43 = vld [vmem:[%s3361_s0 + $0x30] sm:$0xff] }
   0x7   :  { %v42_v35 = vld [vmem:[%s3361_s0 + $0x20] sm:$0xff]  ;;  %v194_v45 = vld [vmem:[%s3365_s4 + $0x28] sm:$0xff]  ;;  %v45_v46 = vld [vmem:[%s3361_s0 + $0x38] sm:$0xff] }
   0x8   :  { %2223 = vmatmul.mubr.msk.f32.vlgmr.msra.gmra.mrb[0].mxu0 %vm55_vm0, %v39_v11  ;;  %v189_v36 = vld [vmem:[%s3365_s4] sm:$0xff]  ;;  %v195_v48 = vld [vmem:[%s3365_s4 + $0x30] sm:$0xff]  ;;  %v196_v49 = vld [vmem:[%s3365_s4 + $0x38] sm:$0xff] }
   0x9   :  { %2503 = vmatpush3.bf16.msra.mxu1 %v2886_v12  ;;  %2225 = vmatprep.mubr.msk.f32.mxu0 %vm55_vm0, %v40_v33  ;;  %v2939_v39 = vpack.c.bf16 %v190_v37, %v189_v36  ;;  %v193_v44 = vld [vmem:[%s3365_s4 + $0x20] sm:$0xff]  ;;  %v2039_v51 = vld [vmem:[%s3362_s8 + $0x8] sm:$0xff]  ;;  %v2985_v52 = vpack.c.bf16 %v196_v49, %v195_v48  ;;  %s2788_s4 = smov 64  }
   0xa   :  { %2516 = vmatprep.subr.bf16.mxu1 %v2784_v0  ;;  %v2968_v47 = vpack.c.bf16 %v194_v45, %v193_v44  ;;  %v3028_v2 = vld [vmem:[%s3366_s5] ss:$0 sm:$0xff]  ;;  %s2789_s5 = smov 96  }
   0xb   :  { %2506 = vmatpush3.bf16.msra.mxu0 %v2939_v39 }
   0xc   :  { %2243 = vmatmul.mubr.msk.f32.vlgmr.msra.gmra.mrb[0].mxu1 %vm214_vm2, %v208_v13  ;;  %2226 = vmatmul.mubr.msk.f32.gmra.mrb[2].mxu0 %vm55_vm0, %v41_v34 }
   0xd   :  { %2518 = vmatpush3.bf16.msra.mxu1 %v2873_v8  ;;  %2272 = vmatprep.mubr.msk.f32.mxu1 %vm2785_vm1, %v2786_v4 }
   0xe   :  { %2519 = vmatprep.subr.bf16.mxu1 %v2784_v0  ;;  %2228 = vmatprep.mubr.msk.f32.mxu0 %vm55_vm0, %v42_v35 }
   0xf   :  { %2507 = vmatprep.subr.bf16.mxu0 %v2784_v0 }
  0x10   :  { %2229 = vmatmul.mubr.msk.f32.gmra.mrb[4].mxu0 %vm55_vm0, %v43_v41 }
  0x11   :  { %2521 = vmatpush3.bf16.msra.mxu1 %v2886_v12  ;;  %2231 = vmatprep.mubr.msk.f32.mxu0 %vm55_vm0, %v44_v43 }
  0x12   :  { %2522 = vmatprep.subr.bf16.mxu1 %v2784_v0  ;;  %2509 = vmatpush3.bf16.msra.mxu0 %v2950_v42 }
  0x13   :  { %2510 = vmatprep.subr.bf16.mxu0 %v2784_v0 }
  0x14   :  { %2232 = vmatmul.mubr.msk.f32.gmra.mrb[6].mxu0 %vm55_vm0, %v45_v46 }
  0x15   :  { %2261 = vmatprep.mubr.msk.f32.mxu0 %vm2785_vm1, %v2786_v4 }
  0x16   :  { %2512 = vmatpush3.bf16.msra.mxu0 %v2968_v47 }
  0x17   :  { %2513 = vmatprep.subr.bf16.mxu0 %v2784_v0 }
  0x1a   :  { %2515 = vmatpush3.bf16.msra.mxu0 %v2985_v52 }
  0x1b   :  { %2534 = vmatprep.subr.bf16.mxu0 %v2784_v0 }
  0xdb   :  { %v2908_v15 = vpop.f32.mrb[0].mxu0 }
  0xdc   :  { %v146_v16 = vpop.f32.mrb[1].mxu0  ;;  %v152_v1 = vadd.f32 %v2908_v15, %v2906_v14  ;;  %v2040_v15 = vld [vmem:[%s3364_s9 + $0x8] sm:$0xff] }
  0xdd   :  { %v147_v17 = vadd.f32 %v2906_v14, %v146_v16 }
  0xdf   :  { %v284_v18 = vpop.f32.mrb[0].mxu1  ;;  %v2992_v55 = vpop.f32.mrb[2].mxu0 }
  0xe0   :  { %v288_v19 = vadd.f32 %v284_v18, %v147_v17  ;;  %v2244_v20 = vpop.f32.mrb[1].mxu1  ;;  %v2994_v56 = vpop.f32.mrb[3].mxu0 }
  0xe1   :  { %v157_v46 = vadd.f32 %v2906_v14, %v2994_v56 }
  0xe2   :  { %2656 = vtanh.f32 %v288_v19  ;;  %v2042_v23 = vmul.f32 -1.442695, %v288_v19 }
  0xe3   :  { %v2996_v57 = vpop.f32.mrb[4].mxu0 }
  0xe4   :  { %2658 = vpow2.f32 %v2042_v23  ;;  %v2998_v58 = vpop.f32.mrb[5].mxu0 }
  0xe7   :  { %v3000_v59 = vpop.f32.mrb[6].mxu0 }
  0xe8   :  { %v3002_v60 = vpop.f32.mrb[7].mxu0 }
  0xec   :  { %v2657_v21 = vpop.eup %2656 }
  0xed   :  { %302 = vrot.lane.b32.xlu0 %v2657_v21, %s2787_s21 }
  0xee   :  { %v2659_v24 = vpop.eup %2658 }
  0xef   :  { %v292_v25 = vadd.f32 1.0, %v2659_v24 }
  0xf1   :  { %297 = vrot.lane.b32.xlu0 %v211_v22, %s2787_s21  ;;  %2660 = vrcp.f32 %v292_v25 }
  0xfb   :  { %v2661_v26 = vpop.eup %2660 }
 0x15f   :  { %v303_v27 = vpop.permute.xlu0 %302 }
 0x160   :  { %v305_v28 = vmul.f32 %v2661_v26, %v303_v27 }
 0x162   :  { %307 = vrot.lane.b32.xlu1 %v305_v28, %s2787_s21 }
 0x163   :  { %v298_v29 = vpop.permute.xlu0 %297 }
 0x164   :  { %v300_v30 = vmul.f32 %v2661_v26, %v298_v29 }
 0x1d4   :  { %v308_v31 = vpop.permute.xlu1 %307 }
 0x1d5   :  { %v2917_v32 = vadd.f32 %v308_v31, %v300_v30 }
 0x1d7   :  { %2662 = vtanh.f32 %v2917_v32 }
 0x1e1   :  { %v2663_v50 = vpop.eup %2662 }
 0x1e2   :  { %313 = vrot.lane.b32.xlu1 %v2663_v50, %s2787_s21 }
 0x1e6   :  { %322 = vrot.lane.b32.xlu1 %v2039_v51, %s2787_s21 }
 0x254   :  { %v314_v53 = vpop.permute.xlu1 %313 }
 0x255   :  { %v316_v54 = vmul.f32 %v2661_v26, %v314_v53 }
 0x257   :  { %318 = vrot.lane.b32.xlu0 %v316_v54, %s2788_s4 }
 0x258   :  { %v323_v61 = vpop.permute.xlu1 %322 }
 0x2c9   :  { %v319_v62 = vpop.permute.xlu0 %318 }
 0x2ca   :  { %v325_v63 = vsel %vm214_vm2, %v319_v62, %v323_v61  ;;  %2273 = vmatmul.mubr.msk.f32.vlgmr.msra.gmra.mrb[2].mxu1 %vm214_vm2, %v319_v62 }
 0x2cb   :  { %2262 = vmatmul.mubr.msk.f32.vlgmr.msra.gmra.mrb[8].mxu0 %vm326_vm3, %v325_v63  ;;  %2524 = vmatpush3.bf16.msra.mxu1 %v2939_v39 }
 0x2cc   :  { %2525 = vmatprep.subr.bf16.mxu1 %v2784_v0  ;;  %2536 = vmatpush3.bf16.msra.mxu0 %v2873_v8 }
 0x2cd   :  { %2537 = vmatprep.subr.bf16.mxu0 %v2784_v0  ;;  %2302 = vmatprep.mubr.msk.f32.mxu0 %vm2785_vm1, %v2786_v4 }
 0x2ce   :  { %2291 = vmatprep.mubr.msk.f32.mxu1 %vm2785_vm1, %v2786_v4 }
 0x2cf   :  { %2527 = vmatpush3.bf16.msra.mxu1 %v2950_v42 }
 0x2d0   :  { %2528 = vmatprep.subr.bf16.mxu1 %v2784_v0  ;;  %2539 = vmatpush3.bf16.msra.mxu0 %v2886_v12 }
 0x2d1   :  { %2540 = vmatprep.subr.bf16.mxu0 %v2784_v0 }
 0x2d3   :  { %2530 = vmatpush3.bf16.msra.mxu1 %v2968_v47 }
 0x2d4   :  { %2531 = vmatprep.subr.bf16.mxu1 %v2784_v0 }
 0x2d7   :  { %2533 = vmatpush3.bf16.msra.mxu1 %v2985_v52 }
 0x2d8   :  { %2552 = vmatprep.subr.bf16.mxu1 %v2784_v0 }
 0x39d   :  { %v496_v3 = vpop.f32.mrb[2].mxu1 }
 0x39e   :  { %v500_v5 = vadd.f32 %v496_v3, %v152_v1  ;;  %v396_v6 = vpop.f32.mrb[8].mxu0  ;;  %v2274_v7 = vpop.f32.mrb[3].mxu1 }
 0x39f   :  { %v397_v9 = vadd.f32 %v3028_v2, %v396_v6  ;;  %v2263_v10 = vpop.f32.mrb[9].mxu0 }
 0x3a0   :  { %2664 = vtanh.f32 %v500_v5  ;;  %v2046_v16 = vmul.f32 -1.442695, %v500_v5 }
 0x3a1   :  { %2666 = vtanh.f32 %v397_v9  ;;  %v2044_v17 = vmul.f32 -1.442695, %v397_v9 }
 0x3a2   :  { %2668 = vpow2.f32 %v2046_v16 }
 0x3a3   :  { %2670 = vpow2.f32 %v2044_v17 }
 0x3aa   :  { %v2665_v11 = vpop.eup %2664 }
 0x3ab   :  { %v2667_v13 = vpop.eup %2666  ;;  %510 = vrot.lane.b32.xlu1 %v2665_v11, %s2787_s21 }
 0x3ac   :  { %413 = vrot.lane.b32.xlu0 %v2667_v13, %s2787_s21  ;;  %v2669_v18 = vpop.eup %2668 }
 0x3ad   :  { %v2671_v19 = vpop.eup %2670  ;;  %v504_v20 = vadd.f32 1.0, %v2669_v18 }
 0x3ae   :  { %v403_v21 = vadd.f32 1.0, %v2671_v19 }
 0x3af   :  { %2672 = vrcp.f32 %v504_v20 }
 0x3b0   :  { %408 = vrot.lane.b32.xlu0 %v2040_v15, %s2787_s21  ;;  %2674 = vrcp.f32 %v403_v21 }
 0x3b9   :  { %v2673_v22 = vpop.eup %2672 }
 0x3ba   :  { %v2675_v24 = vpop.eup %2674  ;;  %v508_v29 = vmul.f32 %v2673_v22, %v2917_v32 }
 0x41d   :  { %v511_v23 = vpop.permute.xlu1 %510 }
 0x41e   :  { %v513_v25 = vmul.f32 %v2673_v22, %v511_v23  ;;  %v414_v26 = vpop.permute.xlu0 %413 }
 0x41f   :  { %v416_v27 = vmul.f32 %v2675_v24, %v414_v26 }
 0x420   :  { %515 = vrot.lane.b32.xlu0 %v513_v25, %s2787_s21 }
 0x421   :  { %418 = vrot.lane.b32.xlu1 %v416_v27, %s2787_s21 }
 0x422   :  { %v409_v28 = vpop.permute.xlu0 %408 }
 0x423   :  { %v411_v30 = vmul.f32 %v2675_v24, %v409_v28 }
 0x492   :  { %v516_v31 = vpop.permute.xlu0 %515 }
 0x493   :  { %v3040_v33 = vadd.f32 %v516_v31, %v508_v29  ;;  %v419_v34 = vpop.permute.xlu1 %418  ;;  %v162_v31 = vadd.f32 %v2992_v55, %v2906_v14 }
 0x494   :  { %v3042_v35 = vadd.f32 %v419_v34, %v411_v30 }
 0x495   :  { %2676 = vtanh.f32 %v3040_v33 }
 0x496   :  { %2678 = vtanh.f32 %v3042_v35 }
 0x49f   :  { %v2677_v36 = vpop.eup %2676 }
 0x4a0   :  { %v2679_v37 = vpop.eup %2678  ;;  %521 = vrot.lane.b32.xlu0 %v2677_v36, %s2787_s21 }
 0x4a1   :  { %424 = vrot.lane.b32.xlu1 %v2679_v37, %s2787_s21 }
 0x512   :  { %v522_v38 = vpop.permute.xlu0 %521 }
 0x513   :  { %v524_v40 = vmul.f32 %v2673_v22, %v522_v38  ;;  %v425_v32 = vpop.permute.xlu1 %424 }
 0x514   :  { %v3048_v41 = vmul.f32 %v2675_v24, %v425_v32 }
 0x515   :  { %526 = vrot.lane.b32.xlu1 %v524_v40, %s2788_s4 }
 0x516   :  { %530 = vrot.lane.b32.xlu0 %v3048_v41, %s2789_s5 }
 0x587   :  { %v527_v43 = vpop.permute.xlu1 %526 }
 0x588   :  { %v531_v44 = vpop.permute.xlu0 %530  ;;  %2303 = vmatmul.mubr.msk.f32.vlgmr.msra.gmra.mrb[10].mxu0 %vm214_vm2, %v527_v43 }
 0x589   :  { %v533_v45 = vsel %vm214_vm2, %v527_v43, %v531_v44  ;;  %2542 = vmatpush3.bf16.msra.mxu0 %v2939_v39  ;;  %2321 = vmatprep.mubr.msk.f32.mxu0 %vm2785_vm1, %v2786_v4 }
 0x58a   :  { %2292 = vmatmul.mubr.msk.f32.vlgmr.msra.gmra.mrb[4].mxu1 %vm326_vm3, %v533_v45  ;;  %2543 = vmatprep.subr.bf16.mxu0 %v2784_v0 }
 0x58b   :  { %2554 = vmatpush3.bf16.msra.mxu1 %v2873_v8  ;;  %2332 = vmatprep.mubr.msk.f32.mxu1 %vm2785_vm1, %v2786_v4 }
 0x58c   :  { %2555 = vmatprep.subr.bf16.mxu1 %v2784_v0 }
 0x58d   :  { %2545 = vmatpush3.bf16.msra.mxu0 %v2950_v42 }
 0x58e   :  { %2546 = vmatprep.subr.bf16.mxu0 %v2784_v0 }
 0x58f   :  { %2557 = vmatpush3.bf16.msra.mxu1 %v2886_v12 }
 0x590   :  { %2558 = vmatprep.subr.bf16.mxu1 %v2784_v0 }
 0x591   :  { %2548 = vmatpush3.bf16.msra.mxu0 %v2968_v47 }
 0x592   :  { %2549 = vmatprep.subr.bf16.mxu0 %v2784_v0 }
 0x595   :  { %2551 = vmatpush3.bf16.msra.mxu0 %v2985_v52 }
 0x596   :  { %2570 = vmatprep.subr.bf16.mxu0 %v2784_v0 }
 0x65b   :  { %v699_v48 = vpop.f32.mrb[10].mxu0 }
 0x65c   :  { %v703_v49 = vadd.f32 %v699_v48, %v157_v46  ;;  %v2304_v50 = vpop.f32.mrb[11].mxu0 }
 0x65d   :  { %v603_v51 = vpop.f32.mrb[4].mxu1 }
 0x65e   :  { %2680 = vtanh.f32 %v703_v49  ;;  %v604_v53 = vadd.f32 %v3028_v2, %v603_v51  ;;  %v2293_v54 = vpop.f32.mrb[5].mxu1  ;;  %v2050_v63 = vmul.f32 -1.442695, %v703_v49 }
 0x660   :  { %2682 = vtanh.f32 %v604_v53  ;;  %v2048_v1 = vmul.f32 -1.442695, %v604_v53 }
 0x661   :  { %2684 = vpow2.f32 %v2050_v63 }
 0x662   :  { %2686 = vpow2.f32 %v2048_v1 }
 0x668   :  { %v2681_v61 = vpop.eup %2680 }
 0x669   :  { %713 = vrot.lane.b32.xlu0 %v2681_v61, %s2787_s21 }
 0x66a   :  { %v2683_v62 = vpop.eup %2682 }
 0x66b   :  { %616 = vrot.lane.b32.xlu1 %v2683_v62, %s2787_s21  ;;  %v2685_v56 = vpop.eup %2684 }
 0x66c   :  { %v2687_v3 = vpop.eup %2686  ;;  %v707_v5 = vadd.f32 1.0, %v2685_v56 }
 0x66d   :  { %v610_v6 = vadd.f32 1.0, %v2687_v3 }
 0x66e   :  { %2688 = vrcp.f32 %v707_v5 }
 0x66f   :  { %2690 = vrcp.f32 %v610_v6 }
 0x678   :  { %v2689_v7 = vpop.eup %2688 }
 0x679   :  { %v2691_v11 = vpop.eup %2690  ;;  %v711_v16 = vmul.f32 %v2689_v7, %v3040_v33 }
 0x67a   :  { %v614_v19 = vmul.f32 %v2691_v11, %v3042_v35 }
 0x6db   :  { %v714_v9 = vpop.permute.xlu0 %713 }
 0x6dc   :  { %v716_v10 = vmul.f32 %v2689_v7, %v714_v9 }
 0x6dd   :  { %v617_v13 = vpop.permute.xlu1 %616 }
 0x6de   :  { %718 = vrot.lane.b32.xlu0 %v716_v10, %s2787_s21  ;;  %v619_v15 = vmul.f32 %v2691_v11, %v617_v13 }
 0x6e0   :  { %621 = vrot.lane.b32.xlu1 %v619_v15, %s2787_s21 }
 0x750   :  { %v719_v17 = vpop.permute.xlu0 %718 }
 0x751   :  { %v3080_v18 = vadd.f32 %v719_v17, %v711_v16 }
 0x752   :  { %v622_v20 = vpop.permute.xlu1 %621 }
 0x753   :  { %2692 = vtanh.f32 %v3080_v18  ;;  %v3084_v21 = vadd.f32 %v622_v20, %v614_v19 }
 0x755   :  { %2694 = vtanh.f32 %v3084_v21 }
 0x75d   :  { %v2693_v22 = vpop.eup %2692 }
 0x75e   :  { %724 = vrot.lane.b32.xlu0 %v2693_v22, %s2787_s21 }
 0x75f   :  { %v2695_v23 = vpop.eup %2694 }
 0x760   :  { %627 = vrot.lane.b32.xlu1 %v2695_v23, %s2787_s21 }
 0x7d0   :  { %v725_v24 = vpop.permute.xlu0 %724 }
 0x7d1   :  { %v727_v25 = vmul.f32 %v2689_v7, %v725_v24 }
 0x7d2   :  { %v628_v26 = vpop.permute.xlu1 %627 }
 0x7d3   :  { %729 = vrot.lane.b32.xlu1 %v727_v25, %s2788_s4  ;;  %v3090_v27 = vmul.f32 %v2691_v11, %v628_v26 }
 0x7d5   :  { %733 = vrot.lane.b32.xlu0 %v3090_v27, %s2789_s5 }
 0x845   :  { %v730_v28 = vpop.permute.xlu1 %729 }
 0x846   :  { %2333 = vmatmul.mubr.msk.f32.vlgmr.msra.gmra.mrb[6].mxu1 %vm214_vm2, %v730_v28 }
 0x847   :  { %2560 = vmatpush3.bf16.msra.mxu1 %v2939_v39  ;;  %2351 = vmatprep.mubr.msk.f32.mxu1 %vm2785_vm1, %v2786_v4  ;;  %v734_v29 = vpop.permute.xlu0 %733 }
 0x848   :  { %2561 = vmatprep.subr.bf16.mxu1 %v2784_v0  ;;  %v736_v30 = vsel %vm214_vm2, %v730_v28, %v734_v29 }
 0x849   :  { %2322 = vmatmul.mubr.msk.f32.vlgmr.msra.gmra.mrb[12].mxu0 %vm326_vm3, %v736_v30 }
 0x84a   :  { %2572 = vmatpush3.bf16.msra.mxu0 %v2873_v8  ;;  %2362 = vmatprep.mubr.msk.f32.mxu0 %vm2785_vm1, %v2786_v4 }
 0x84b   :  { %2563 = vmatpush3.bf16.msra.mxu1 %v2950_v42  ;;  %2573 = vmatprep.subr.bf16.mxu0 %v2784_v0 }
 0x84c   :  { %2564 = vmatprep.subr.bf16.mxu1 %v2784_v0 }
 0x84e   :  { %2575 = vmatpush3.bf16.msra.mxu0 %v2886_v12 }
 0x84f   :  { %2566 = vmatpush3.bf16.msra.mxu1 %v2968_v47  ;;  %2576 = vmatprep.subr.bf16.mxu0 %v2784_v0 }
 0x850   :  { %2567 = vmatprep.subr.bf16.mxu1 %v2784_v0 }
 0x853   :  { %2569 = vmatpush3.bf16.msra.mxu1 %v2985_v52 }
 0x854   :  { %2588 = vmatprep.subr.bf16.mxu1 %v2784_v0 }
 0x919   :  { %v902_v33 = vpop.f32.mrb[6].mxu1 }
 0x91a   :  { %v906_v34 = vadd.f32 %v902_v33, %v162_v31  ;;  %v2334_v35 = vpop.f32.mrb[7].mxu1 }
 0x91c   :  { %2696 = vtanh.f32 %v906_v34  ;;  %v806_v36 = vpop.f32.mrb[12].mxu0  ;;  %v2054_v43 = vmul.f32 -1.442695, %v906_v34 }
 0x91d   :  { %v807_v37 = vadd.f32 %v3028_v2, %v806_v36  ;;  %v2323_v38 = vpop.f32.mrb[13].mxu0 }
 0x91f   :  { %2698 = vtanh.f32 %v807_v37  ;;  %v2052_v44 = vmul.f32 -1.442695, %v807_v37 }
 0x920   :  { %2700 = vpow2.f32 %v2054_v43 }
 0x921   :  { %2702 = vpow2.f32 %v2052_v44 }
 0x926   :  { %v2697_v40 = vpop.eup %2696 }
 0x927   :  { %916 = vrot.lane.b32.xlu0 %v2697_v40, %s2787_s21 }
 0x929   :  { %v2699_v32 = vpop.eup %2698 }
 0x92a   :  { %819 = vrot.lane.b32.xlu1 %v2699_v32, %s2787_s21  ;;  %v2701_v55 = vpop.eup %2700 }
 0x92b   :  { %v910_v45 = vadd.f32 1.0, %v2701_v55  ;;  %v2703_v46 = vpop.eup %2702 }
 0x92c   :  { %v813_v48 = vadd.f32 1.0, %v2703_v46 }
 0x92d   :  { %2704 = vrcp.f32 %v910_v45 }
 0x92e   :  { %2706 = vrcp.f32 %v813_v48 }
 0x937   :  { %v2705_v49 = vpop.eup %2704 }
 0x938   :  { %v2707_v53 = vpop.eup %2706  ;;  %v914_v62 = vmul.f32 %v2705_v49, %v3080_v18  ;;  %v167_v18 = vadd.f32 %v2906_v14, %v2998_v58 }
 0x939   :  { %v817_v56 = vmul.f32 %v2707_v53, %v3084_v21 }
 0x999   :  { %v917_v50 = vpop.permute.xlu0 %916 }
 0x99a   :  { %v919_v51 = vmul.f32 %v2705_v49, %v917_v50 }
 0x99c   :  { %921 = vrot.lane.b32.xlu0 %v919_v51, %s2787_s21  ;;  %v820_v54 = vpop.permute.xlu1 %819 }
 0x99d   :  { %v822_v61 = vmul.f32 %v2707_v53, %v820_v54 }
 0x99f   :  { %824 = vrot.lane.b32.xlu1 %v822_v61, %s2787_s21 }
 0xa0e   :  { %v922_v63 = vpop.permute.xlu0 %921 }
 0xa0f   :  { %v3121_v1 = vadd.f32 %v922_v63, %v914_v62 }
 0xa11   :  { %2708 = vtanh.f32 %v3121_v1  ;;  %v825_v3 = vpop.permute.xlu1 %824 }
 0xa12   :  { %v3125_v5 = vadd.f32 %v825_v3, %v817_v56 }
 0xa14   :  { %2710 = vtanh.f32 %v3125_v5 }
 0xa1b   :  { %v2709_v6 = vpop.eup %2708 }
 0xa1c   :  { %927 = vrot.lane.b32.xlu0 %v2709_v6, %s2787_s21 }
 0xa1e   :  { %v2711_v7 = vpop.eup %2710 }
 0xa1f   :  { %830 = vrot.lane.b32.xlu1 %v2711_v7, %s2787_s21 }
 0xa8e   :  { %v928_v9 = vpop.permute.xlu0 %927 }
 0xa8f   :  { %v930_v10 = vmul.f32 %v2705_v49, %v928_v9 }
 0xa91   :  { %932 = vrot.lane.b32.xlu1 %v930_v10, %s2788_s4  ;;  %v831_v11 = vpop.permute.xlu1 %830 }
 0xa92   :  { %v3131_v13 = vmul.f32 %v2707_v53, %v831_v11 }
 0xa94   :  { %936 = vrot.lane.b32.xlu0 %v3131_v13, %s2789_s5 }
 0xb03   :  { %v933_v15 = vpop.permute.xlu1 %932 }
 0xb04   :  { %2363 = vmatmul.mubr.msk.f32.vlgmr.msra.gmra.mrb[14].mxu0 %vm214_vm2, %v933_v15 }
 0xb05   :  { %2578 = vmatpush3.bf16.msra.mxu0 %v2939_v39  ;;  %2381 = vmatprep.mubr.msk.f32.mxu0 %vm2785_vm1, %v2786_v4 }
 0xb06   :  { %2579 = vmatprep.subr.bf16.mxu0 %v2784_v0  ;;  %v937_v16 = vpop.permute.xlu0 %936 }
 0xb07   :  { %v939_v17 = vsel %vm214_vm2, %v933_v15, %v937_v16 }
 0xb08   :  { %2352 = vmatmul.mubr.msk.f32.vlgmr.msra.gmra.mrb[8].mxu1 %vm326_vm3, %v939_v17 }
 0xb09   :  { %2581 = vmatpush3.bf16.msra.mxu0 %v2950_v42  ;;  %2590 = vmatpush3.bf16.msra.mxu1 %v2873_v8 }
 0xb0a   :  { %2582 = vmatprep.subr.bf16.mxu0 %v2784_v0  ;;  %2591 = vmatprep.subr.bf16.mxu1 %v2784_v0 }
 0xb0b   :  { %2392 = vmatprep.mubr.msk.f32.mxu1 %vm2785_vm1, %v2786_v4 }
 0xb0d   :  { %2584 = vmatpush3.bf16.msra.mxu0 %v2968_v47  ;;  %2593 = vmatpush3.bf16.msra.mxu1 %v2886_v12 }
 0xb0e   :  { %2585 = vmatprep.subr.bf16.mxu0 %v2784_v0  ;;  %2594 = vmatprep.subr.bf16.mxu1 %v2784_v0 }
 0xb11   :  { %2587 = vmatpush3.bf16.msra.mxu0 %v2985_v52 }
 0xb12   :  { %2606 = vmatprep.subr.bf16.mxu0 %v2784_v0 }
 0xbd7   :  { %v1105_v19 = vpop.f32.mrb[14].mxu0 }
 0xbd8   :  { %v1109_v20 = vadd.f32 %v1105_v19, %v167_v18  ;;  %v2364_v21 = vpop.f32.mrb[15].mxu0 }
 0xbda   :  { %2712 = vtanh.f32 %v1109_v20  ;;  %v2058_v28 = vmul.f32 -1.442695, %v1109_v20 }
 0xbdb   :  { %v1009_v22 = vpop.f32.mrb[8].mxu1 }
 0xbdc   :  { %v1010_v23 = vadd.f32 %v3028_v2, %v1009_v22  ;;  %v2353_v24 = vpop.f32.mrb[9].mxu1 }
 0xbde   :  { %2714 = vtanh.f32 %v1010_v23  ;;  %v2056_v29 = vmul.f32 -1.442695, %v1010_v23 }
 0xbdf   :  { %2716 = vpow2.f32 %v2058_v28 }
 0xbe0   :  { %2718 = vpow2.f32 %v2056_v29 }
 0xbe4   :  { %v2713_v25 = vpop.eup %2712 }
 0xbe5   :  { %1119 = vrot.lane.b32.xlu0 %v2713_v25, %s2787_s21 }
 0xbe8   :  { %v2715_v26 = vpop.eup %2714 }
 0xbe9   :  { %1022 = vrot.lane.b32.xlu1 %v2715_v26, %s2787_s21  ;;  %v2717_v58 = vpop.eup %2716 }
 0xbea   :  { %v1113_v30 = vadd.f32 1.0, %v2717_v58  ;;  %v2719_v31 = vpop.eup %2718 }
 0xbeb   :  { %v1016_v33 = vadd.f32 1.0, %v2719_v31 }
 0xbec   :  { %2720 = vrcp.f32 %v1113_v30 }
 0xbed   :  { %2722 = vrcp.f32 %v1016_v33 }
 0xbf6   :  { %v2721_v34 = vpop.eup %2720 }
 0xbf7   :  { %v2723_v37 = vpop.eup %2722  ;;  %v1117_v32 = vmul.f32 %v2721_v34, %v3121_v1  ;;  %v172_v1 = vadd.f32 %v2996_v57, %v2906_v14 }
 0xbf8   :  { %v1020_v55 = vmul.f32 %v2723_v37, %v3125_v5 }
 0xc57   :  { %v1120_v35 = vpop.permute.xlu0 %1119 }
 0xc58   :  { %v1122_v36 = vmul.f32 %v2721_v34, %v1120_v35 }
 0xc5a   :  { %1124 = vrot.lane.b32.xlu0 %v1122_v36, %s2787_s21 }
 0xc5b   :  { %v1023_v38 = vpop.permute.xlu1 %1022 }
 0xc5c   :  { %v1025_v40 = vmul.f32 %v2723_v37, %v1023_v38 }
 0xc5e   :  { %1027 = vrot.lane.b32.xlu1 %v1025_v40, %s2787_s21 }
 0xccc   :  { %v1125_v43 = vpop.permute.xlu0 %1124 }
 0xccd   :  { %v3162_v44 = vadd.f32 %v1125_v43, %v1117_v32 }
 0xccf   :  { %2724 = vtanh.f32 %v3162_v44 }
 0xcd0   :  { %v1028_v45 = vpop.permute.xlu1 %1027 }
 0xcd1   :  { %v3166_v46 = vadd.f32 %v1028_v45, %v1020_v55 }
 0xcd3   :  { %2726 = vtanh.f32 %v3166_v46 }
 0xcd9   :  { %v2725_v48 = vpop.eup %2724 }
 0xcda   :  { %1130 = vrot.lane.b32.xlu0 %v2725_v48, %s2787_s21 }
 0xcdd   :  { %v2727_v49 = vpop.eup %2726 }
 0xcde   :  { %1033 = vrot.lane.b32.xlu1 %v2727_v49, %s2787_s21 }
 0xd4c   :  { %v1131_v50 = vpop.permute.xlu0 %1130 }
 0xd4d   :  { %v1133_v51 = vmul.f32 %v2721_v34, %v1131_v50 }
 0xd4f   :  { %1135 = vrot.lane.b32.xlu1 %v1133_v51, %s2788_s4 }
 0xd50   :  { %v1034_v53 = vpop.permute.xlu1 %1033 }
 0xd51   :  { %v3172_v54 = vmul.f32 %v2723_v37, %v1034_v53 }
 0xd53   :  { %1139 = vrot.lane.b32.xlu0 %v3172_v54, %s2789_s5 }
 0xdc1   :  { %v1136_v61 = vpop.permute.xlu1 %1135 }
 0xdc2   :  { %2393 = vmatmul.mubr.msk.f32.vlgmr.msra.gmra.mrb[10].mxu1 %vm214_vm2, %v1136_v61 }
 0xdc3   :  { %2596 = vmatpush3.bf16.msra.mxu1 %v2939_v39  ;;  %2411 = vmatprep.mubr.msk.f32.mxu1 %vm2785_vm1, %v2786_v4 }
 0xdc4   :  { %2597 = vmatprep.subr.bf16.mxu1 %v2784_v0 }
 0xdc5   :  { %v1140_v62 = vpop.permute.xlu0 %1139 }
 0xdc6   :  { %v1142_v63 = vsel %vm214_vm2, %v1136_v61, %v1140_v62 }
 0xdc7   :  { %2599 = vmatpush3.bf16.msra.mxu1 %v2950_v42  ;;  %2382 = vmatmul.mubr.msk.f32.vlgmr.msra.gmra.mrb[16].mxu0 %vm326_vm3, %v1142_v63 }
 0xdc8   :  { %2600 = vmatprep.subr.bf16.mxu1 %v2784_v0  ;;  %2608 = vmatpush3.bf16.msra.mxu0 %v2873_v8 }
 0xdc9   :  { %2422 = vmatprep.mubr.msk.f32.mxu0 %vm2785_vm1, %v2786_v4  ;;  %2609 = vmatprep.subr.bf16.mxu0 %v2784_v0 }
 0xdcb   :  { %2602 = vmatpush3.bf16.msra.mxu1 %v2968_v47 }
 0xdcc   :  { %2603 = vmatprep.subr.bf16.mxu1 %v2784_v0  ;;  %2611 = vmatpush3.bf16.msra.mxu0 %v2886_v12 }
 0xdcd   :  { %2612 = vmatprep.subr.bf16.mxu0 %v2784_v0 }
 0xdcf   :  { %2605 = vmatpush3.bf16.msra.mxu1 %v2985_v52 }
 0xdd0   :  { %2624 = vmatprep.subr.bf16.mxu1 %v2784_v0 }
 0xe95   :  { %v1308_v56 = vpop.f32.mrb[10].mxu1 }
 0xe96   :  { %v1312_v3 = vadd.f32 %v1308_v56, %v172_v1  ;;  %v2394_v5 = vpop.f32.mrb[11].mxu1 }
 0xe98   :  { %2728 = vtanh.f32 %v1312_v3  ;;  %v2062_v15 = vmul.f32 -1.442695, %v1312_v3 }
 0xe9a   :  { %v1212_v6 = vpop.f32.mrb[16].mxu0 }
 0xe9b   :  { %v1213_v7 = vadd.f32 %v3028_v2, %v1212_v6  ;;  %v2383_v9 = vpop.f32.mrb[17].mxu0 }
 0xe9d   :  { %2730 = vtanh.f32 %v1213_v7  ;;  %v2060_v16 = vmul.f32 -1.442695, %v1213_v7 }
 0xe9e   :  { %2732 = vpow2.f32 %v2062_v15 }
 0xe9f   :  { %2734 = vpow2.f32 %v2060_v16 }
 0xea2   :  { %v2729_v10 = vpop.eup %2728 }
 0xea3   :  { %1322 = vrot.lane.b32.xlu0 %v2729_v10, %s2787_s21 }
 0xea7   :  { %v2731_v11 = vpop.eup %2730 }
 0xea8   :  { %1225 = vrot.lane.b32.xlu1 %v2731_v11, %s2787_s21  ;;  %v2733_v57 = vpop.eup %2732 }
 0xea9   :  { %v1316_v17 = vadd.f32 1.0, %v2733_v57  ;;  %v2735_v18 = vpop.eup %2734 }
 0xeaa   :  { %v1219_v19 = vadd.f32 1.0, %v2735_v18 }
 0xeab   :  { %2736 = vrcp.f32 %v1316_v17 }
 0xeac   :  { %2738 = vrcp.f32 %v1219_v19 }
 0xeb5   :  { %v2737_v20 = vpop.eup %2736 }
 0xeb6   :  { %v2739_v23 = vpop.eup %2738  ;;  %v1320_v26 = vmul.f32 %v2737_v20, %v3162_v44  ;;  %v177_v44 = vadd.f32 %v2906_v14, %v3002_v60 }
 0xeb7   :  { %v1223_v58 = vmul.f32 %v2739_v23, %v3166_v46 }
 0xf15   :  { %v1323_v21 = vpop.permute.xlu0 %1322 }
 0xf16   :  { %v1325_v22 = vmul.f32 %v2737_v20, %v1323_v21 }
 0xf18   :  { %1327 = vrot.lane.b32.xlu0 %v1325_v22, %s2787_s21 }
 0xf1a   :  { %v1226_v24 = vpop.permute.xlu1 %1225 }
 0xf1b   :  { %v1228_v25 = vmul.f32 %v2739_v23, %v1226_v24 }
 0xf1d   :  { %1230 = vrot.lane.b32.xlu1 %v1228_v25, %s2787_s21 }
 0xf8a   :  { %v1328_v28 = vpop.permute.xlu0 %1327 }
 0xf8b   :  { %v3203_v29 = vadd.f32 %v1328_v28, %v1320_v26 }
 0xf8d   :  { %2740 = vtanh.f32 %v3203_v29 }
 0xf8f   :  { %v1231_v30 = vpop.permute.xlu1 %1230 }
 0xf90   :  { %v3207_v31 = vadd.f32 %v1231_v30, %v1223_v58 }
 0xf92   :  { %2742 = vtanh.f32 %v3207_v31 }
 0xf97   :  { %v2741_v33 = vpop.eup %2740 }
 0xf98   :  { %1333 = vrot.lane.b32.xlu0 %v2741_v33, %s2787_s21 }
 0xf9c   :  { %v2743_v34 = vpop.eup %2742 }
 0xf9d   :  { %1236 = vrot.lane.b32.xlu1 %v2743_v34, %s2787_s21 }
0x100a   :  { %v1334_v35 = vpop.permute.xlu0 %1333 }
0x100b   :  { %v1336_v36 = vmul.f32 %v2737_v20, %v1334_v35 }
0x100d   :  { %1338 = vrot.lane.b32.xlu1 %v1336_v36, %s2788_s4 }
0x100f   :  { %v1237_v37 = vpop.permute.xlu1 %1236 }
0x1010   :  { %v3213_v38 = vmul.f32 %v2739_v23, %v1237_v37 }
0x1012   :  { %1342 = vrot.lane.b32.xlu0 %v3213_v38, %s2789_s5 }
0x107f   :  { %v1339_v40 = vpop.permute.xlu1 %1338 }
0x1080   :  { %2423 = vmatmul.mubr.msk.f32.vlgmr.msra.gmra.mrb[18].mxu0 %vm214_vm2, %v1339_v40 }
0x1081   :  { %2614 = vmatpush3.bf16.msra.mxu0 %v2939_v39  ;;  %2441 = vmatprep.mubr.msk.f32.mxu0 %vm2785_vm1, %v2786_v4 }
0x1082   :  { %2615 = vmatprep.subr.bf16.mxu0 %v2784_v0 }
0x1084   :  { %v1343_v32 = vpop.permute.xlu0 %1342 }
0x1085   :  { %2617 = vmatpush3.bf16.msra.mxu0 %v2950_v42  ;;  %v1345_v43 = vsel %vm214_vm2, %v1339_v40, %v1343_v32 }
0x1086   :  { %2618 = vmatprep.subr.bf16.mxu0 %v2784_v0  ;;  %2412 = vmatmul.mubr.msk.f32.vlgmr.msra.gmra.mrb[12].mxu1 %vm326_vm3, %v1345_v43 }
0x1087   :  { %2626 = vmatpush3.bf16.msra.mxu1 %v2873_v8  ;;  %2452 = vmatprep.mubr.msk.f32.mxu1 %vm2785_vm1, %v2786_v4 }
0x1088   :  { %2627 = vmatprep.subr.bf16.mxu1 %v2784_v0 }
0x1089   :  { %2620 = vmatpush3.bf16.msra.mxu0 %v2968_v47 }
0x108a   :  { %2621 = vmatprep.subr.bf16.mxu0 %v2784_v0 }
0x108b   :  { %2629 = vmatpush3.bf16.msra.mxu1 %v2886_v12 }
0x108c   :  { %2630 = vmatprep.subr.bf16.mxu1 %v2784_v0 }
0x108d   :  { %2623 = vmatpush3.bf16.msra.mxu0 %v2985_v52 }
0x1153   :  { %v1511_v55 = vpop.f32.mrb[18].mxu0 }
0x1154   :  { %v1515_v8 = vadd.f32 %v1511_v55, %v177_v44  ;;  %v2424_v45 = vpop.f32.mrb[19].mxu0 }
0x1156   :  { %2744 = vtanh.f32 %v1515_v8  ;;  %v2066_v51 = vmul.f32 -1.442695, %v1515_v8 }
0x1159   :  { %v1415_v46 = vpop.f32.mrb[12].mxu1 }
0x115a   :  { %v1416_v48 = vadd.f32 %v3028_v2, %v1415_v46  ;;  %v2413_v49 = vpop.f32.mrb[13].mxu1 }
0x115c   :  { %2746 = vtanh.f32 %v1416_v48  ;;  %v2064_v53 = vmul.f32 -1.442695, %v1416_v48 }
0x115d   :  { %2748 = vpow2.f32 %v2066_v51 }
0x115e   :  { %2750 = vpow2.f32 %v2064_v53 }
0x1160   :  { %v2745_v50 = vpop.eup %2744 }
0x1161   :  { %1525 = vrot.lane.b32.xlu0 %v2745_v50, %s2787_s21 }
0x1166   :  { %v2747_v12 = vpop.eup %2746 }
0x1167   :  { %1428 = vrot.lane.b32.xlu1 %v2747_v12, %s2787_s21  ;;  %v2749_v60 = vpop.eup %2748 }
0x1168   :  { %v1519_v61 = vadd.f32 1.0, %v2749_v60  ;;  %v2751_v62 = vpop.eup %2750 }
0x1169   :  { %v1422_v63 = vadd.f32 1.0, %v2751_v62 }
0x116a   :  { %2752 = vrcp.f32 %v1519_v61 }
0x116b   :  { %2754 = vrcp.f32 %v1422_v63 }
0x1174   :  { %v2753_v1 = vpop.eup %2752 }
0x1175   :  { %v2755_v5 = vpop.eup %2754  ;;  %v1523_v9 = vmul.f32 %v2753_v1, %v3203_v29 }
0x1176   :  { %v1426_v15 = vmul.f32 %v2755_v5, %v3207_v31 }
0x11d3   :  { %v1526_v56 = vpop.permute.xlu0 %1525 }
0x11d4   :  { %v1528_v3 = vmul.f32 %v2753_v1, %v1526_v56 }
0x11d6   :  { %1530 = vrot.lane.b32.xlu0 %v1528_v3, %s2787_s21 }
0x11d9   :  { %v1429_v6 = vpop.permute.xlu1 %1428 }
0x11da   :  { %v1431_v7 = vmul.f32 %v2755_v5, %v1429_v6 }
0x11dc   :  { %1433 = vrot.lane.b32.xlu1 %v1431_v7, %s2787_s21 }
0x1248   :  { %v1531_v10 = vpop.permute.xlu0 %1530 }
0x1249   :  { %v1533_v11 = vadd.f32 %v1531_v10, %v1523_v9 }
0x124b   :  { %2756 = vtanh.f32 %v1533_v11 }
0x124e   :  { %v1434_v16 = vpop.permute.xlu1 %1433 }
0x124f   :  { %v1436_v57 = vadd.f32 %v1434_v16, %v1426_v15  ;;  %v205_v15 = vld [vmem:[%s3368_s6 + $0x8] sm:$0xff] }
0x1251   :  { %2758 = vtanh.f32 %v1436_v57 }
0x1255   :  { %v2757_v17 = vpop.eup %2756 }
0x1256   :  { %1536 = vrot.lane.b32.xlu0 %v2757_v17, %s2787_s21 }
0x125b   :  { %v2759_v18 = vpop.eup %2758 }
0x125c   :  { %1439 = vrot.lane.b32.xlu1 %v2759_v18, %s2787_s21 }
0x12c8   :  { %v1537_v19 = vpop.permute.xlu0 %1536 }
0x12c9   :  { %v1539_v20 = vmul.f32 %v2753_v1, %v1537_v19 }
0x12cb   :  { %1541 = vrot.lane.b32.xlu1 %v1539_v20, %s2788_s4 }
0x12ce   :  { %v1440_v21 = vpop.permute.xlu1 %1439 }
0x12cf   :  { %v3247_v22 = vmul.f32 %v2755_v5, %v1440_v21 }
0x12d1   :  { %1545 = vrot.lane.b32.xlu0 %v3247_v22, %s2789_s5 }
0x133d   :  { %v1542_v23 = vpop.permute.xlu1 %1541 }
0x133e   :  { %2453 = vmatmul.mubr.msk.f32.vlgmr.msra.gmra.mrb[14].mxu1 %vm214_vm2, %v1542_v23 }
0x133f   :  { %2632 = vmatpush3.bf16.msra.mxu1 %v2939_v39  ;;  %2471 = vmatprep.mubr.msk.f32.mxu1 %vm2785_vm1, %v2786_v4  ;;  %v182_v4 = vadd.f32 %v3000_v59, %v2906_v14 }
0x1340   :  { %2633 = vmatprep.subr.bf16.mxu1 %v2784_v0 }
0x1343   :  { %2635 = vmatpush3.bf16.msra.mxu1 %v2950_v42  ;;  %v1546_v24 = vpop.permute.xlu0 %1545 }
0x1344   :  { %2636 = vmatprep.subr.bf16.mxu1 %v2784_v0  ;;  %v1548_v25 = vsel %vm214_vm2, %v1542_v23, %v1546_v24 }
0x1345   :  { %2442 = vmatmul.mubr.msk.f32.vlgmr.msra.gmra.mrb[20].mxu0 %vm326_vm3, %v1548_v25 }
0x1347   :  { %2638 = vmatpush3.bf16.msra.mxu1 %v2968_v47 }
0x1348   :  { %2639 = vmatprep.subr.bf16.mxu1 %v2784_v0 }
0x134b   :  { %2641 = vmatpush3.bf16.msra.mxu1 %v2985_v52 }
0x1411   :  { %v1714_v39 = vpop.f32.mrb[14].mxu1 }
0x1412   :  { %v1718_v26 = vadd.f32 %v1714_v39, %v182_v4  ;;  %v2454_v28 = vpop.f32.mrb[15].mxu1 }
0x1414   :  { %2760 = vtanh.f32 %v1718_v26  ;;  %v2070_v0 = vmul.f32 -1.442695, %v1718_v26 }
0x1418   :  { %v1618_v42 = vpop.f32.mrb[20].mxu0 }
0x1419   :  { %v1619_v29 = vadd.f32 %v3028_v2, %v1618_v42  ;;  %v2443_v58 = vpop.f32.mrb[21].mxu0  ;;  %v2073_v42 = vld [vmem:[%s3370_s7] ss:$0 sm:$0xff] }
0x141b   :  { %2762 = vtanh.f32 %v1619_v29  ;;  %v2068_v52 = vmul.f32 -1.442695, %v1619_v29 }
0x141c   :  { %2764 = vpow2.f32 %v2070_v0 }
0x141d   :  { %2766 = vpow2.f32 %v2068_v52 }
0x141e   :  { %v2761_v30 = vpop.eup %2760 }
0x141f   :  { %1728 = vrot.lane.b32.xlu0 %v2761_v30, %s2787_s21 }
0x1425   :  { %v2763_v47 = vpop.eup %2762 }
0x1426   :  { %1631 = vrot.lane.b32.xlu1 %v2763_v47, %s2787_s21  ;;  %v2765_v14 = vpop.eup %2764 }
0x1427   :  { %v1722_v59 = vadd.f32 1.0, %v2765_v14  ;;  %v2767_v31 = vpop.eup %2766 }
0x1428   :  { %v1625_v33 = vadd.f32 1.0, %v2767_v31 }
0x1429   :  { %2768 = vrcp.f32 %v1722_v59 }
0x142a   :  { %2770 = vrcp.f32 %v1625_v33 }
0x1433   :  { %v2769_v34 = vpop.eup %2768 }
0x1434   :  { %v2771_v37 = vpop.eup %2770  ;;  %v1726_v43 = vmul.f32 %v2769_v34, %v1533_v11 }
0x1435   :  { %v1629_v8 = vmul.f32 %v2771_v37, %v1436_v57 }
0x1491   :  { %v1729_v35 = vpop.permute.xlu0 %1728 }
0x1492   :  { %v1731_v36 = vmul.f32 %v2769_v34, %v1729_v35 }
0x1494   :  { %1733 = vrot.lane.b32.xlu0 %v1731_v36, %s2787_s21 }
0x1498   :  { %v1632_v40 = vpop.permute.xlu1 %1631 }
0x1499   :  { %v1634_v32 = vmul.f32 %v2771_v37, %v1632_v40 }
0x149b   :  { %1636 = vrot.lane.b32.xlu1 %v1634_v32, %s2787_s21 }
0x1506   :  { %v1734_v44 = vpop.permute.xlu0 %1733 }
0x1507   :  { %v1736_v55 = vadd.f32 %v1734_v44, %v1726_v43 }
0x1509   :  { %2772 = vtanh.f32 %v1736_v55 }
0x150d   :  { %v1637_v45 = vpop.permute.xlu1 %1636 }
0x150e   :  { %v1639_v46 = vadd.f32 %v1637_v45, %v1629_v8 }
0x1510   :  { %2774 = vtanh.f32 %v1639_v46 }
0x1513   :  { %v2773_v48 = vpop.eup %2772 }
0x1514   :  { %1739 = vrot.lane.b32.xlu0 %v2773_v48, %s2787_s21 }
0x151a   :  { %v2775_v49 = vpop.eup %2774 }
0x151b   :  { %1642 = vrot.lane.b32.xlu1 %v2775_v49, %s2787_s21 }
0x1586   :  { %v1740_v50 = vpop.permute.xlu0 %1739 }
0x1587   :  { %v1742_v12 = vmul.f32 %v2769_v34, %v1740_v50 }
0x1589   :  { %1744 = vrot.lane.b32.xlu1 %v1742_v12, %s2788_s4 }
0x158d   :  { %v1643_v51 = vpop.permute.xlu1 %1642 }
0x158e   :  { %v1645_v53 = vmul.f32 %v2771_v37, %v1643_v51 }
0x1590   :  { %1748 = vrot.lane.b32.xlu0 %v1645_v53, %s2789_s5 }
0x15fb   :  { %v1745_v60 = vpop.permute.xlu1 %1744 }
0x15fc   :  { %2002 = vst.msk [vmem:[%s3367_s11] sm:$0xff] %vm214_vm2, %v1745_v60 }
0x1602   :  { %v1749_v61 = vpop.permute.xlu0 %1748 }
0x1603   :  { %v1751_v62 = vsel %vm214_vm2, %v1745_v60, %v1749_v61 }
0x1604   :  { %2472 = vmatmul.mubr.msk.f32.vlgmr.msra.gmra.mrb[16].mxu1 %vm326_vm3, %v1751_v62 }
0x16d7   :  { %v1821_v63 = vpop.f32.mrb[16].mxu1 }
0x16d8   :  { %v1822_v1 = vadd.f32 %v3028_v2, %v1821_v63  ;;  %v2473_v56 = vpop.f32.mrb[17].mxu1  ;;  %v204_v2 = vld [vmem:[%s3368_s6] sm:$0xff] }
0x16d9   :  { %v2642_v16 = vpack.c.bf16 %v205_v15, %v204_v2 }
0x16da   :  { %2776 = vtanh.f32 %v1822_v1  ;;  %v2072_v5 = vmul.f32 -1.442695, %v1822_v1 }
0x16db   :  { %2643 = vmatprep.subr.bf16.mxu0 %v2642_v16 }
0x16dc   :  { %2778 = vpow2.f32 %v2072_v5  ;;  %2645 = vmatpush3.bf16.msra.mxu0 %v2642_v16 }
0x16e4   :  { %v2777_v3 = vpop.eup %2776 }
0x16e5   :  { %1834 = vrot.lane.b32.xlu1 %v2777_v3, %s2787_s21 }
0x16e6   :  { %v2779_v6 = vpop.eup %2778 }
0x16e7   :  { %v1828_v7 = vadd.f32 1.0, %v2779_v6 }
0x16e9   :  { %2780 = vrcp.f32 %v1828_v7 }
0x16f3   :  { %v2781_v9 = vpop.eup %2780 }
0x1757   :  { %v1835_v10 = vpop.permute.xlu1 %1834 }
0x1758   :  { %v1837_v11 = vmul.f32 %v2781_v9, %v1835_v10 }
0x175a   :  { %1839 = vrot.lane.b32.xlu0 %v1837_v11, %s2787_s21 }
0x175e   :  { %1857 = vrot.lane.b32.xlu0 %v3048_v41, %s2788_s4  ;;  %v206_v41 = vld [vmem:[%s3368_s6 + $0x10] sm:$0xff] }
0x1762   :  { %1861 = vrot.lane.b32.xlu0 %v3131_v13, %s2788_s4  ;;  %v207_v13 = vld [vmem:[%s3368_s6 + $0x18] sm:$0xff] }
0x1763   :  { %v2646_v57 = vpack.c.bf16 %v207_v13, %v206_v41 }
0x1765   :  { %2647 = vmatprep.subr.bf16.mxu0 %v2646_v57 }
0x1766   :  { %1865 = vrot.lane.b32.xlu0 %v3213_v38, %s2788_s4  ;;  %v1832_v38 = vmul.f32 %v2781_v9, %v1639_v46  ;;  %2649 = vmatpush3.bf16.msra.mxu0 %v2646_v57 }
0x176a   :  { %1869 = vrot.lane.b32.xlu0 %v1645_v53, %s2788_s4 }
0x176e   :  { %2004 = vrot.lane.b32.xlu0 %v1736_v55, %s2789_s5 }
0x17cc   :  { %v1840_v17 = vpop.permute.xlu0 %1839 }
0x17cd   :  { %v1842_v18 = vadd.f32 %v1840_v17, %v1832_v38 }
0x17cf   :  { %2782 = vtanh.f32 %v1842_v18 }
0x17d0   :  { %v1858_v19 = vpop.permute.xlu0 %1857 }
0x17d1   :  { %2482 = vmatprep.mubr.msk.f32.mxu0 %vm214_vm2, %v1858_v19 }
0x17d4   :  { %v1862_v20 = vpop.permute.xlu0 %1861 }
0x17d8   :  { %v1866_v21 = vpop.permute.xlu0 %1865 }
0x17d9   :  { %v2783_v23 = vpop.eup %2782 }
0x17da   :  { %1845 = vrot.lane.b32.xlu1 %v2783_v23, %s2787_s21 }
0x17dc   :  { %v1870_v24 = vpop.permute.xlu0 %1869 }
0x17de   :  { %1859 = vrot.lane.b32.xlu1 %v3090_v27, %s2788_s4 }
0x17e0   :  { %v2005_v25 = vpop.permute.xlu0 %2004 }
0x17e1   :  { %2007 = vst.msk [vmem:[%s3369_s12] sm:$0xff] %vm214_vm2, %v2005_v25 }
0x17e2   :  { %1863 = vrot.lane.b32.xlu1 %v3172_v54, %s2788_s4 }
0x17e6   :  { %1867 = vrot.lane.b32.xlu1 %v3247_v22, %s2788_s4 }
0x184c   :  { %v1846_v4 = vpop.permute.xlu1 %1845 }
0x184d   :  { %v1848_v39 = vmul.f32 %v2781_v9, %v1846_v4 }
0x184f   :  { %1871 = vrot.lane.b32.xlu1 %v1848_v39, %s2788_s4 }
0x1850   :  { %v1860_v26 = vpop.permute.xlu1 %1859 }
0x1851   :  { %2483 = vmatmul.mubr.msk.f32.vlgmr.msra.gmra.mrb[22].mxu0 %vm214_vm2, %v1860_v26 }
0x1852   :  { %2485 = vmatprep.mubr.msk.f32.mxu0 %vm214_vm2, %v1862_v20 }
0x1853   :  { %2012 = vrot.lane.b32.xlu1 %v1842_v18, %s2789_s5 }
0x1854   :  { %v1864_v27 = vpop.permute.xlu1 %1863 }
0x1855   :  { %2486 = vmatmul.mubr.msk.f32.gmra.mrb[24].mxu0 %vm214_vm2, %v1864_v27 }
0x1856   :  { %2488 = vmatprep.mubr.msk.f32.mxu0 %vm214_vm2, %v1866_v21 }
0x1858   :  { %v1868_v54 = vpop.permute.xlu1 %1867 }
0x1859   :  { %2489 = vmatmul.mubr.msk.f32.gmra.mrb[26].mxu0 %vm214_vm2, %v1868_v54 }
0x185a   :  { %2491 = vmatprep.mubr.msk.f32.mxu0 %vm214_vm2, %v1870_v24 }
0x18c1   :  { %v1872_v22 = vpop.permute.xlu1 %1871 }
0x18c2   :  { %2082 = vst.msk [vmem:[%s3367_s11 + $0x8] sm:$0xff] %vm214_vm2, %v1872_v22  ;;  %2492 = vmatmul.mubr.msk.f32.gmra.mrb[28].mxu0 %vm214_vm2, %v1872_v22 }
0x18c5   :  { %v2013_v28 = vpop.permute.xlu1 %2012 }
0x18c6   :  { %2083 = vst.msk [vmem:[%s3369_s12 + $0x8] sm:$0xff] %vm214_vm2, %v2013_v28 }
0x1924   :  { %v2484_v29 = vpop.f32.mrb[22].mxu0 }
0x1925   :  { %v1961_v58 = vadd.f32 %v2484_v29, %v2073_v42  ;;  %v1955_v30 = vpop.f32.mrb[23].mxu0 }
0x1926   :  { %v1956_v47 = vadd.f32 %v2073_v42, %v1955_v30 }
0x1927   :  { %1995 = vst [vmem:[%s3371_s10 + $0x8] sm:$0xff] %v1961_v58 }
0x1928   :  { %1994 = vst [vmem:[%s3371_s10] sm:$0xff] %v1956_v47  ;;  %v2487_v0 = vpop.f32.mrb[24].mxu0 }
0x1929   :  { %v1971_v52 = vadd.f32 %v2487_v0, %v2073_v42  ;;  %v1965_v14 = vpop.f32.mrb[25].mxu0 }
0x192a   :  { %v1966_v59 = vadd.f32 %v2073_v42, %v1965_v14 }
0x192b   :  { %1997 = vst [vmem:[%s3371_s10 + $0x18] sm:$0xff] %v1971_v52 }
0x192c   :  { %1996 = vst [vmem:[%s3371_s10 + $0x10] sm:$0xff] %v1966_v59  ;;  %v2490_v31 = vpop.f32.mrb[26].mxu0 }
0x192d   :  { %v1981_v33 = vadd.f32 %v2490_v31, %v2073_v42  ;;  %v1975_v34 = vpop.f32.mrb[27].mxu0 }
0x192e   :  { %v1976_v35 = vadd.f32 %v2073_v42, %v1975_v34 }
0x192f   :  { %1999 = vst [vmem:[%s3371_s10 + $0x28] sm:$0xff] %v1981_v33 }
0x1930   :  { %1998 = vst [vmem:[%s3371_s10 + $0x20] sm:$0xff] %v1976_v35 }
0x1995   :  { %v2493_v36 = vpop.f32.mrb[28].mxu0 }
0x1996   :  { %v1991_v37 = vadd.f32 %v2493_v36, %v2073_v42  ;;  %v1985_v40 = vpop.f32.mrb[29].mxu0 }
0x1997   :  { %v1986_v32 = vadd.f32 %v2073_v42, %v1985_v40 }
0x1998   :  { %2001 = vst [vmem:[%s3371_s10 + $0x38] sm:$0xff] %v1991_v37 }
0x1999   :  { %2000 = vst [vmem:[%s3371_s10 + $0x30] sm:$0xff] %v1986_v32 }

</bundles_post_ra>
